<compile_context>
chip_gen: v5e
topology: v5e:2x2
jax: 0.10.0
libtpu: 0.0.40
codegen_flags: <defaults>
</compile_context>

<pallas_src>
import functools

import jax
import jax.numpy as jnp
from jax.experimental import pallas as pl
from jax.experimental.pallas import tpu as pltpu


def _round_up(n, m):
    return ((n + m - 1) // m) * m


def _detect_num_tensorcores():
    """Best-effort TensorCores-per-device (megacore v4/v5p, v7x => 2)."""
    try:
        dev = jax.local_devices()[0]
        for attr in ("num_cores", "core_count"):
            n = getattr(dev, attr, None)
            if isinstance(n, int) and n > 0:
                return n
        kind = str(getattr(dev, "device_kind", "")).lower()
        if any(tag in kind for tag in ("v4", "v5p", "v7", "7x")):
            return 2
    except Exception:
        pass
    return 1


_NUM_TENSORCORES = _detect_num_tensorcores()


def _decoder_kernel(x_ref,
                    w1_ref, b1_ref,
                    w2_ref, b2_ref,
                    w3_ref, b3_ref,
                    w4_ref, b4_ref,
                    w5_ref, b5_ref,
                    o_ref, *, compute_dtype):
    """Fused 5-layer MLP: (Linear+ReLU) x4 then Linear+Tanh.

    Matmuls run on the MXU in `compute_dtype` (bf16 by default) with f32
    accumulation; bias-add / ReLU / tanh stay in f32 on the VPU/EUP.
    """

    def linear(h, w_ref, b_ref):
        return jnp.dot(h.astype(compute_dtype), w_ref[...],
                       preferred_element_type=jnp.float32) + b_ref[...]

    h = x_ref[...]
    h = jnp.maximum(linear(h, w1_ref, b1_ref), 0.0)
    h = jnp.maximum(linear(h, w2_ref, b2_ref), 0.0)
    h = jnp.maximum(linear(h, w3_ref, b3_ref), 0.0)
    h = jnp.maximum(linear(h, w4_ref, b4_ref), 0.0)
    o_ref[...] = jnp.tanh(linear(h, w5_ref, b5_ref))


def init_decoder_params(key, hidden_dim, data_dim):
    """Deterministic PyTorch-style init: U(-1/sqrt(fan_in), 1/sqrt(fan_in)).

    Weights are stored as (in_features, out_features) — i.e. already
    transposed relative to torch.nn.Linear.weight.
    """
    dims = [hidden_dim, 2 ** 6, 2 ** 7, 2 ** 8, 2 ** 8, data_dim]
    params = []
    for i in range(5):
        fan_in, fan_out = dims[i], dims[i + 1]
        key, kw, kb = jax.random.split(key, 3)
        bound = 1.0 / jnp.sqrt(float(fan_in))
        w = jax.random.uniform(kw, (fan_in, fan_out), jnp.float32, -bound, bound)
        b = jax.random.uniform(kb, (1, fan_out), jnp.float32, -bound, bound)
        params.append((w, b))
    return params


@functools.partial(jax.jit, static_argnames=("block_rows", "use_bf16",
                                              "num_cores"))
def decoder_cont_emb_forward(x, params, block_rows=1024, use_bf16=True,
                             num_cores=_NUM_TENSORCORES):
    """Run the fused MLP kernel over (batch, hidden_dim) input x.

    Handles arbitrary batch sizes by zero-padding the batch to the tile size;
    hidden layer 1 and the output feature dim are zero-padded to multiples of
    128 (lane-dense), and all padding is sliced off before returning.
    """
    batch, hidden_dim = x.shape
    data_dim = params[-1][0].shape[1]
    compute_dtype = jnp.bfloat16 if use_bf16 else jnp.float32

    # ---- parameter padding / casting (lane-dense, numerically exact) ------
    (w1, b1), (w2, b2), (w3, b3), (w4, b4), (w5, b5) = params
    pad1 = _round_up(w1.shape[1], 128) - w1.shape[1]
    if pad1:
        w1 = jnp.pad(w1, ((0, 0), (0, pad1)))
        b1 = jnp.pad(b1, ((0, 0), (0, pad1)))
        w2 = jnp.pad(w2, ((0, pad1), (0, 0)))      # ReLU(0)=0 -> exact
    padded_data_dim = _round_up(data_dim, 128)
    pad5 = padded_data_dim - data_dim
    if pad5:
        w5 = jnp.pad(w5, ((0, 0), (0, pad5)))
        b5 = jnp.pad(b5, ((0, 0), (0, pad5)))      # tanh(0)=0, sliced off
    params_p = [(w.astype(compute_dtype), b.astype(jnp.float32))
                for (w, b) in ((w1, b1), (w2, b2), (w3, b3), (w4, b4), (w5, b5))]

    # ---- batch tiling (generation-aware) -----------------------------------
    batch_aligned = _round_up(batch, 8)
    rows = min(block_rows, batch_aligned)
    if num_cores > 1 and batch_aligned >= 8 * num_cores:
        # Keep at least one tile per TensorCore so "parallel" sharding has
        # work for every core (v7x / megacore).
        per_core = _round_up(pl.cdiv(batch_aligned, num_cores), 8)
        rows = min(rows, per_core)
    block_rows_eff = max(_round_up(rows, 8), 8)
    padded_batch = _round_up(batch_aligned, block_rows_eff)
    grid_len = padded_batch // block_rows_eff

    # Input stays f32 at the kernel boundary (tiny DMA at hidden_dim=32);
    # it is cast to compute_dtype inside the kernel just before the MXU.
    x_p = x.astype(jnp.float32)
    if padded_batch != batch:
        x_p = jnp.pad(x_p, ((0, padded_batch - batch), (0, 0)))

    # ---- specs -------------------------------------------------------------
    flat_params = []
    in_specs = [pl.BlockSpec((block_rows_eff, hidden_dim), lambda i: (i, 0))]
    for (w, b) in params_p:
        flat_params.extend([w, b])
        # Constant block index: weights/biases stay resident across the grid.
        in_specs.append(pl.BlockSpec(w.shape, lambda i: (0, 0)))
        in_specs.append(pl.BlockSpec(b.shape, lambda i: (0, 0)))

    # ---- VMEM budget: raise the scoped limit for big tiles -----------------
    bpe_w = 2 if use_bf16 else 4
    weight_bytes = sum(w.size * bpe_w + b.size * 4 for (w, b) in params_p)
    # Double-buffered x/out tiles + headroom for the largest f32 intermediates.
    act_bytes = block_rows_eff * (2 * hidden_dim * 4
                                  + 2 * padded_data_dim * 4
                                  + 4 * 256 * 4)
    vmem_limit = int(min(max(32 * 1024 * 1024, 2 * (weight_bytes + act_bytes)),
                         56 * 1024 * 1024))   # stay under v7x's 64 MiB VMEM

    out = pl.pallas_call(
        functools.partial(_decoder_kernel, compute_dtype=compute_dtype),
        out_shape=jax.ShapeDtypeStruct((padded_batch, padded_data_dim),
                                       jnp.float32),
        grid_spec=pltpu.PrefetchScalarGridSpec(
            num_scalar_prefetch=0,
            grid=(grid_len,),
            in_specs=in_specs,
            out_specs=pl.BlockSpec((block_rows_eff, padded_data_dim),
                                   lambda i: (i, 0)),
        ),
        compiler_params=pltpu.CompilerParams(
            dimension_semantics=("parallel",),
            vmem_limit_bytes=vmem_limit,
        ),
    )(x_p, *flat_params)

    return out[:batch, :data_dim]


def decoder_cont_emb_reference(x, params):
    """Pure-JAX f32 reference for correctness checking."""
    h = x
    for idx, (w, b) in enumerate(params):
        h = h @ w + b
        if idx < len(params) - 1:
            h = jnp.maximum(h, 0.0)
        else:
            h = jnp.tanh(h)
    return h


if __name__ == "__main__":
    hidden_dim = 32
    data_dim = 16
    # Deliberately NOT a multiple of the tile size, to exercise the padding
    # path (and the per-core tiling on dual-TensorCore parts).
    batch = 200

    key = jax.random.PRNGKey(0)
    key_x, key_p = jax.random.split(key)

    x = jax.random.normal(key_x, (batch, hidden_dim), dtype=jnp.float32)
    params = init_decoder_params(key_p, hidden_dim, data_dim)

    ref = decoder_cont_emb_reference(x, params)

    # Exact path (f32 matmuls) — verifies the kernel structure bit-tightly.
    out_f32 = jax.block_until_ready(
        decoder_cont_emb_forward(x, params, use_bf16=False))
    assert out_f32.shape == (batch, data_dim)
    assert jnp.allclose(out_f32, ref, atol=2e-5, rtol=2e-5), \
        "f32 path mismatch vs reference"

    # Default fast path (bf16 matmuls, f32 accumulation) — looser tolerance.
    out_bf16 = jax.block_until_ready(decoder_cont_emb_forward(x, params))
    assert out_bf16.shape == (batch, data_dim)
    assert jnp.allclose(out_bf16, ref, atol=5e-2, rtol=5e-2), \
        "bf16 path mismatch vs reference"

    # Smaller tile config to exercise grid_len > 1 on single-core chips too.
    out_small = jax.block_until_ready(
        decoder_cont_emb_forward(x, params, block_rows=64))
    assert jnp.allclose(out_small, ref, atol=5e-2, rtol=5e-2), \
        "tiled bf16 path mismatch vs reference"

    print("KERNEL_OK")
</pallas_src>

<mosaic_0001>
module attributes {stable_mosaic.version = 11 : i64} {
  func.func @_decoder_kernel(%arg0: i32, %arg1: memref<200x32xf32, #tpu.memory_space<vmem>>, %arg2: memref<32x128xf32, #tpu.memory_space<vmem>>, %arg3: memref<1x128xf32, #tpu.memory_space<vmem>>, %arg4: memref<128x128xf32, #tpu.memory_space<vmem>>, %arg5: memref<1x128xf32, #tpu.memory_space<vmem>>, %arg6: memref<128x256xf32, #tpu.memory_space<vmem>>, %arg7: memref<1x256xf32, #tpu.memory_space<vmem>>, %arg8: memref<256x256xf32, #tpu.memory_space<vmem>>, %arg9: memref<1x256xf32, #tpu.memory_space<vmem>>, %arg10: memref<256x128xf32, #tpu.memory_space<vmem>>, %arg11: memref<1x128xf32, #tpu.memory_space<vmem>>, %arg12: memref<200x128xf32, #tpu.memory_space<vmem>>) attributes {dimension_semantics = [#tpu.dimension_semantics<parallel>], iteration_bounds = array<i64: 1>, scalar_prefetch = 0 : i64, scratch_operands = 0 : i64, tpu.core_type = #tpu.core_type<tc>, window_params = [{transform_indices = @transform_0, window_bounds = array<i64: 200, 32>}, {pipeline_mode = #tpu.pipeline_mode<synchronous>, transform_indices = @transform_1, window_bounds = array<i64: 32, 128>}, {pipeline_mode = #tpu.pipeline_mode<synchronous>, transform_indices = @transform_2, window_bounds = array<i64: 1, 128>}, {pipeline_mode = #tpu.pipeline_mode<synchronous>, transform_indices = @transform_3, window_bounds = array<i64: 128, 128>}, {pipeline_mode = #tpu.pipeline_mode<synchronous>, transform_indices = @transform_4, window_bounds = array<i64: 1, 128>}, {pipeline_mode = #tpu.pipeline_mode<synchronous>, transform_indices = @transform_5, window_bounds = array<i64: 128, 256>}, {pipeline_mode = #tpu.pipeline_mode<synchronous>, transform_indices = @transform_6, window_bounds = array<i64: 1, 256>}, {pipeline_mode = #tpu.pipeline_mode<synchronous>, transform_indices = @transform_7, window_bounds = array<i64: 256, 256>}, {pipeline_mode = #tpu.pipeline_mode<synchronous>, transform_indices = @transform_8, window_bounds = array<i64: 1, 256>}, {pipeline_mode = #tpu.pipeline_mode<synchronous>, transform_indices = @transform_9, window_bounds = array<i64: 256, 128>}, {pipeline_mode = #tpu.pipeline_mode<synchronous>, transform_indices = @transform_10, window_bounds = array<i64: 1, 128>}, {transform_indices = @transform_11, window_bounds = array<i64: 200, 128>}]} {
    %c0 = arith.constant 0 : index
    %c0_0 = arith.constant 0 : index
    %0 = vector.load %arg1[%c0, %c0_0] : memref<200x32xf32, #tpu.memory_space<vmem>>, vector<200x32xf32>
    %c0_1 = arith.constant 0 : index
    %c0_2 = arith.constant 0 : index
    %1 = vector.load %arg2[%c0_1, %c0_2] : memref<32x128xf32, #tpu.memory_space<vmem>>, vector<32x128xf32>
    %cst = arith.constant dense<0.000000e+00> : vector<200x128xf32>
    %2 = tpu.matmul %0, %1, %cst {dimension_numbers = #tpu.dot_dimension_numbers<[1], [0], [0], [1], [0, 0, 1, 1], [], []>} : vector<200x32xf32>, vector<32x128xf32>, vector<200x128xf32> -> vector<200x128xf32>
    %c0_3 = arith.constant 0 : index
    %c0_4 = arith.constant 0 : index
    %3 = vector.load %arg3[%c0_3, %c0_4] : memref<1x128xf32, #tpu.memory_space<vmem>>, vector<1x128xf32>
    %4 = vector.broadcast %3 : vector<1x128xf32> to vector<200x128xf32>
    %5 = arith.addf %2, %4 : vector<200x128xf32>
    %cst_5 = arith.constant 0.000000e+00 : f32
    %6 = vector.broadcast %cst_5 : f32 to vector<200x128xf32>
    %7 = arith.maximumf %5, %6 : vector<200x128xf32>
    %c0_6 = arith.constant 0 : index
    %c0_7 = arith.constant 0 : index
    %8 = vector.load %arg4[%c0_6, %c0_7] : memref<128x128xf32, #tpu.memory_space<vmem>>, vector<128x128xf32>
    %cst_8 = arith.constant dense<0.000000e+00> : vector<200x128xf32>
    %9 = tpu.matmul %7, %8, %cst_8 {dimension_numbers = #tpu.dot_dimension_numbers<[1], [0], [0], [1], [0, 0, 1, 1], [], []>} : vector<200x128xf32>, vector<128x128xf32>, vector<200x128xf32> -> vector<200x128xf32>
    %c0_9 = arith.constant 0 : index
    %c0_10 = arith.constant 0 : index
    %10 = vector.load %arg5[%c0_9, %c0_10] : memref<1x128xf32, #tpu.memory_space<vmem>>, vector<1x128xf32>
    %11 = vector.broadcast %10 : vector<1x128xf32> to vector<200x128xf32>
    %12 = arith.addf %9, %11 : vector<200x128xf32>
    %cst_11 = arith.constant 0.000000e+00 : f32
    %13 = vector.broadcast %cst_11 : f32 to vector<200x128xf32>
    %14 = arith.maximumf %12, %13 : vector<200x128xf32>
    %c0_12 = arith.constant 0 : index
    %c0_13 = arith.constant 0 : index
    %15 = vector.load %arg6[%c0_12, %c0_13] : memref<128x256xf32, #tpu.memory_space<vmem>>, vector<128x256xf32>
    %cst_14 = arith.constant dense<0.000000e+00> : vector<200x256xf32>
    %16 = tpu.matmul %14, %15, %cst_14 {dimension_numbers = #tpu.dot_dimension_numbers<[1], [0], [0], [1], [0, 0, 1, 1], [], []>} : vector<200x128xf32>, vector<128x256xf32>, vector<200x256xf32> -> vector<200x256xf32>
    %c0_15 = arith.constant 0 : index
    %c0_16 = arith.constant 0 : index
    %17 = vector.load %arg7[%c0_15, %c0_16] : memref<1x256xf32, #tpu.memory_space<vmem>>, vector<1x256xf32>
    %18 = vector.broadcast %17 : vector<1x256xf32> to vector<200x256xf32>
    %19 = arith.addf %16, %18 : vector<200x256xf32>
    %cst_17 = arith.constant 0.000000e+00 : f32
    %20 = vector.broadcast %cst_17 : f32 to vector<200x256xf32>
    %21 = arith.maximumf %19, %20 : vector<200x256xf32>
    %c0_18 = arith.constant 0 : index
    %c0_19 = arith.constant 0 : index
    %22 = vector.load %arg8[%c0_18, %c0_19] : memref<256x256xf32, #tpu.memory_space<vmem>>, vector<256x256xf32>
    %cst_20 = arith.constant dense<0.000000e+00> : vector<200x256xf32>
    %23 = tpu.matmul %21, %22, %cst_20 {dimension_numbers = #tpu.dot_dimension_numbers<[1], [0], [0], [1], [0, 0, 1, 1], [], []>} : vector<200x256xf32>, vector<256x256xf32>, vector<200x256xf32> -> vector<200x256xf32>
    %c0_21 = arith.constant 0 : index
    %c0_22 = arith.constant 0 : index
    %24 = vector.load %arg9[%c0_21, %c0_22] : memref<1x256xf32, #tpu.memory_space<vmem>>, vector<1x256xf32>
    %25 = vector.broadcast %24 : vector<1x256xf32> to vector<200x256xf32>
    %26 = arith.addf %23, %25 : vector<200x256xf32>
    %cst_23 = arith.constant 0.000000e+00 : f32
    %27 = vector.broadcast %cst_23 : f32 to vector<200x256xf32>
    %28 = arith.maximumf %26, %27 : vector<200x256xf32>
    %c0_24 = arith.constant 0 : index
    %c0_25 = arith.constant 0 : index
    %29 = vector.load %arg10[%c0_24, %c0_25] : memref<256x128xf32, #tpu.memory_space<vmem>>, vector<256x128xf32>
    %cst_26 = arith.constant dense<0.000000e+00> : vector<200x128xf32>
    %30 = tpu.matmul %28, %29, %cst_26 {dimension_numbers = #tpu.dot_dimension_numbers<[1], [0], [0], [1], [0, 0, 1, 1], [], []>} : vector<200x256xf32>, vector<256x128xf32>, vector<200x128xf32> -> vector<200x128xf32>
    %c0_27 = arith.constant 0 : index
    %c0_28 = arith.constant 0 : index
    %31 = vector.load %arg11[%c0_27, %c0_28] : memref<1x128xf32, #tpu.memory_space<vmem>>, vector<1x128xf32>
    %32 = vector.broadcast %31 : vector<1x128xf32> to vector<200x128xf32>
    %33 = arith.addf %30, %32 : vector<200x128xf32>
    %34 = math.tanh %33 : vector<200x128xf32>
    %c0_29 = arith.constant 0 : index
    %c0_30 = arith.constant 0 : index
    %35 = vector.load %arg12[%c0_29, %c0_30] : memref<200x128xf32, #tpu.memory_space<vmem>>, vector<200x128xf32>
    tpu.vector_store %arg12[%c0_29, %c0_30], %34 {strides = array<i32>} : memref<200x128xf32, #tpu.memory_space<vmem>>, vector<200x128xf32>,
    return
  }
  func.func @transform_0(%arg0: i32) -> (i32, i32) {
    %c0_i32 = arith.constant 0 : i32
    %c0_i32_0 = arith.constant 0 : i32
    return %arg0, %c0_i32 : i32, i32
  }
  func.func @transform_1(%arg0: i32) -> (i32, i32) {
    %c0_i32 = arith.constant 0 : i32
    %c0_i32_0 = arith.constant 0 : i32
    %c0_i32_1 = arith.constant 0 : i32
    return %c0_i32, %c0_i32_0 : i32, i32
  }
  func.func @transform_2(%arg0: i32) -> (i32, i32) {
    %c0_i32 = arith.constant 0 : i32
    %c0_i32_0 = arith.constant 0 : i32
    %c0_i32_1 = arith.constant 0 : i32
    return %c0_i32, %c0_i32_0 : i32, i32
  }
  func.func @transform_3(%arg0: i32) -> (i32, i32) {
    %c0_i32 = arith.constant 0 : i32
    %c0_i32_0 = arith.constant 0 : i32
    %c0_i32_1 = arith.constant 0 : i32
    return %c0_i32, %c0_i32_0 : i32, i32
  }
  func.func @transform_4(%arg0: i32) -> (i32, i32) {
    %c0_i32 = arith.constant 0 : i32
    %c0_i32_0 = arith.constant 0 : i32
    %c0_i32_1 = arith.constant 0 : i32
    return %c0_i32, %c0_i32_0 : i32, i32
  }
  func.func @transform_5(%arg0: i32) -> (i32, i32) {
    %c0_i32 = arith.constant 0 : i32
    %c0_i32_0 = arith.constant 0 : i32
    %c0_i32_1 = arith.constant 0 : i32
    return %c0_i32, %c0_i32_0 : i32, i32
  }
  func.func @transform_6(%arg0: i32) -> (i32, i32) {
    %c0_i32 = arith.constant 0 : i32
    %c0_i32_0 = arith.constant 0 : i32
    %c0_i32_1 = arith.constant 0 : i32
    return %c0_i32, %c0_i32_0 : i32, i32
  }
  func.func @transform_7(%arg0: i32) -> (i32, i32) {
    %c0_i32 = arith.constant 0 : i32
    %c0_i32_0 = arith.constant 0 : i32
    %c0_i32_1 = arith.constant 0 : i32
    return %c0_i32, %c0_i32_0 : i32, i32
  }
  func.func @transform_8(%arg0: i32) -> (i32, i32) {
    %c0_i32 = arith.constant 0 : i32
    %c0_i32_0 = arith.constant 0 : i32
    %c0_i32_1 = arith.constant 0 : i32
    return %c0_i32, %c0_i32_0 : i32, i32
  }
  func.func @transform_9(%arg0: i32) -> (i32, i32) {
    %c0_i32 = arith.constant 0 : i32
    %c0_i32_0 = arith.constant 0 : i32
    %c0_i32_1 = arith.constant 0 : i32
    return %c0_i32, %c0_i32_0 : i32, i32
  }
  func.func @transform_10(%arg0: i32) -> (i32, i32) {
    %c0_i32 = arith.constant 0 : i32
    %c0_i32_0 = arith.constant 0 : i32
    %c0_i32_1 = arith.constant 0 : i32
    return %c0_i32, %c0_i32_0 : i32, i32
  }
  func.func @transform_11(%arg0: i32) -> (i32, i32) {
    %c0_i32 = arith.constant 0 : i32
    %c0_i32_0 = arith.constant 0 : i32
    return %arg0, %c0_i32 : i32, i32
  }
}

</mosaic_0001>

<bundles_post_ra>
// kernel: decoder_cont_emb_forward.1
= control target key start
LH: loop header
LB: loop body
LE: loop exit
PB: predicated region body
PF: predicated region fallthrough
CT: control target
= control target key end

     0   :  { %vm71_vm0 = vcmask 261120   ;;  %s3054_s1 = inlined_call_operand.vmem [shape: f32[32,128], index: 1, kind: input, shape index: {}]   ;;  %s3055_s0 = inlined_call_operand.vmem [shape: f32[200,32], index: 0, kind: input, shape index: {}]   ;;  %s3056_s2 = inlined_call_operand.vmem [shape: f32[1,128], index: 2, kind: input, shape index: {}]   ;;  %s3057_s3 = inlined_call_operand.vmem [shape: f32[128,128], index: 3, kind: input, shape index: {}]   ;;  %s3058_s4 = inlined_call_operand.vmem [shape: f32[1,128], index: 4, kind: input, shape index: {}]   ;;  %s3059_s5 = inlined_call_operand.vmem [shape: f32[128,256], index: 5, kind: input, shape index: {}]   ;;  %s3060_s7 = inlined_call_operand.vmem [shape: f32[256,256], index: 7, kind: input, shape index: {}]   ;;  %s3061_s6 = inlined_call_operand.vmem [shape: f32[1,256], index: 6, kind: input, shape index: {}]   ;;  %s3062_s9 = inlined_call_operand.vmem [shape: f32[256,128], index: 9, kind: input, shape index: {}]   ;;  %s3063_s8 = inlined_call_operand.vmem [shape: f32[1,256], index: 8, kind: input, shape index: {}]   ;;  %s3064_s10 = inlined_call_operand.vmem [shape: f32[1,128], index: 10, kind: input, shape index: {}]   ;;  %s3065_s11 = inlined_call_operand.vmem [shape: f32[200,128], index: 11, kind: output, shape index: {}]  }
   0x1   :  { %v66_v0 = vld [vmem:[%s3054_s1 + $0x18] sm:$0xff]  ;;  %v65_v1 = vld [vmem:[%s3054_s1 + $0x10] sm:$0xff]  ;;  %v64_v2 = vld [vmem:[%s3054_s1 + $0x8] sm:$0xff] }
   0x2   :  { %159 = vmatpush.msra.mxu0 %v66_v0  ;;  %1460 = vmatpush.msra.mxu3 %v66_v0  ;;  %v63_v3 = vld [vmem:[%s3054_s1] sm:$0xff]  ;;  %v39_v5 = vld [vmem:[%s3055_s0 + $0x8] sm:$0xff]  ;;  %v40_v6 = vld [vmem:[%s3055_s0 + $0x10] sm:$0xff] }
   0x3   :  { %v38_v4 = vld [vmem:[%s3055_s0] sm:$0xff]  ;;  %v41_v7 = vld [vmem:[%s3055_s0 + $0x18] sm:$0xff]  ;;  %v43_v9 = vld [vmem:[%s3055_s0 + $0x28] sm:$0xff] }
   0x4   :  { %160 = vmatpush.msra.mxu0 %v65_v1  ;;  %1461 = vmatpush.msra.mxu3 %v65_v1  ;;  %v42_v8 = vld [vmem:[%s3055_s0 + $0x20] sm:$0xff]  ;;  %v44_v10 = vld [vmem:[%s3055_s0 + $0x30] sm:$0xff]  ;;  %v45_v11 = vld [vmem:[%s3055_s0 + $0x38] sm:$0xff] }
   0x5   :  { %v46_v12 = vld [vmem:[%s3055_s0 + $0x40] sm:$0xff]  ;;  %v279_v13 = vld [vmem:[%s3057_s3 + $0x78] sm:$0xff]  ;;  %v278_v14 = vld [vmem:[%s3057_s3 + $0x70] sm:$0xff] }
   0x6   :  { %161 = vmatpush.msra.mxu0 %v64_v2  ;;  %1462 = vmatpush.msra.mxu3 %v64_v2  ;;  %v277_v15 = vld [vmem:[%s3057_s3 + $0x68] sm:$0xff]  ;;  %v276_v17 = vld [vmem:[%s3057_s3 + $0x60] sm:$0xff]  ;;  %v52_v18 = vld [vmem:[%s3055_s0 + $0x70] sm:$0xff] }
   0x7   :  { %284 = vmatpush.msra.mxu1 %v279_v13  ;;  %1464 = vmatpush.msra.mxu2 %v279_v13  ;;  %v47_v16 = vld [vmem:[%s3055_s0 + $0x48] sm:$0xff]  ;;  %v275_v19 = vld [vmem:[%s3057_s3 + $0x58] sm:$0xff]  ;;  %v274_v20 = vld [vmem:[%s3057_s3 + $0x50] sm:$0xff] }
   0x8   :  { %162 = vmatpush.msra.mxu0 %v63_v3  ;;  %1463 = vmatpush.msra.mxu3 %v63_v3  ;;  %v273_v21 = vld [vmem:[%s3057_s3 + $0x48] sm:$0xff]  ;;  %v48_v22 = vld [vmem:[%s3055_s0 + $0x50] sm:$0xff]  ;;  %v272_v23 = vld [vmem:[%s3057_s3 + $0x40] sm:$0xff] }
   0x9   :  { %1435 = vmatmul.msk.f32.vlgmr.msra.gmra.mxu0 %vm71_vm0, %v38_v4  ;;  %285 = vmatpush.msra.mxu1 %v278_v14  ;;  %v53_v24 = vld [vmem:[%s3055_s0 + $0x78] sm:$0xff]  ;;  %v270_v26 = vld [vmem:[%s3057_s3 + $0x30] sm:$0xff]  ;;  %v269_v27 = vld [vmem:[%s3057_s3 + $0x28] sm:$0xff] }
   0xa   :  { %1465 = vmatpush.msra.mxu2 %v278_v14  ;;  %1449 = vmatmul.msk.f32.vlgmr.msra.gmra.mxu3 %vm71_vm0, %v52_v18  ;;  %v271_v25 = vld [vmem:[%s3057_s3 + $0x38] sm:$0xff]  ;;  %v268_v29 = vld [vmem:[%s3057_s3 + $0x20] sm:$0xff]  ;;  %v266_v32 = vld [vmem:[%s3057_s3 + $0x10] sm:$0xff] }
   0xb   :  { %286 = vmatpush.msra.mxu1 %v277_v15  ;;  %v49_v28 = vld [vmem:[%s3055_s0 + $0x58] sm:$0xff]  ;;  %v54_v30 = vld [vmem:[%s3055_s0 + $0x80] sm:$0xff]  ;;  %v265_v34 = vld [vmem:[%s3057_s3 + $0x8] sm:$0xff] }
   0xc   :  { %1466 = vmatpush.msra.mxu2 %v277_v15  ;;  %v267_v31 = vld [vmem:[%s3057_s3 + $0x18] sm:$0xff]  ;;  %v50_v33 = vld [vmem:[%s3055_s0 + $0x60] sm:$0xff]  ;;  %v55_v36 = vld [vmem:[%s3055_s0 + $0x88] sm:$0xff] }
   0xd   :  { %287 = vmatpush.msra.mxu1 %v276_v17  ;;  %v264_v35 = vld [vmem:[%s3057_s3] sm:$0xff]  ;;  %v51_v37 = vld [vmem:[%s3055_s0 + $0x68] sm:$0xff]  ;;  %v56_v38 = vld [vmem:[%s3055_s0 + $0x90] sm:$0xff] }
   0xe   :  { %1467 = vmatpush.msra.mxu2 %v276_v17  ;;  %v57_v39 = vld [vmem:[%s3055_s0 + $0x98] sm:$0xff]  ;;  %v58_v40 = vld [vmem:[%s3055_s0 + $0xa0] sm:$0xff]  ;;  %v59_v44 = vld [vmem:[%s3055_s0 + $0xa8] sm:$0xff] }
   0xf   :  { %288 = vmatpush.msra.mxu1 %v275_v19  ;;  %v1740_v41 = vld [vmem:[%s3056_s2] ss:$0 sm:$0xff]  ;;  %v60_v48 = vld [vmem:[%s3055_s0 + $0xb0] sm:$0xff]  ;;  %v61_v52 = vld [vmem:[%s3055_s0 + $0xb8] sm:$0xff] }
  0x10   :  { %1468 = vmatpush.msra.mxu2 %v275_v19  ;;  %v62_v56 = vld [vmem:[%s3055_s0 + $0xc0] sm:$0xff]  ;;  %v430_v13 = vld [vmem:[%s3059_s5 + $0xe8] sm:$0xff]  ;;  %v428_v15 = vld [vmem:[%s3059_s5 + $0xd8] sm:$0xff] }
  0x11   :  { %1436 = vmatmul.msk.f32.gmra.mxu0 %vm71_vm0, %v39_v5  ;;  %289 = vmatpush.msra.mxu1 %v274_v20  ;;  %v429_v14 = vld [vmem:[%s3059_s5 + $0xe0] sm:$0xff]  ;;  %v426_v17 = vld [vmem:[%s3059_s5 + $0xc8] sm:$0xff]  ;;  %v424_v18 = vld [vmem:[%s3059_s5 + $0xb8] sm:$0xff] }
  0x12   :  { %1469 = vmatpush.msra.mxu2 %v274_v20  ;;  %1450 = vmatmul.msk.f32.gmra.mxu3 %vm71_vm0, %v53_v24  ;;  %v427_v19 = vld [vmem:[%s3059_s5 + $0xd0] sm:$0xff]  ;;  %v422_v20 = vld [vmem:[%s3059_s5 + $0xa8] sm:$0xff] }
  0x13   :  { %290 = vmatpush.msra.mxu1 %v273_v21 }
  0x14   :  { %1470 = vmatpush.msra.mxu2 %v273_v21 }
  0x15   :  { %291 = vmatpush.msra.mxu1 %v272_v23 }
  0x16   :  { %1471 = vmatpush.msra.mxu2 %v272_v23  ;;  %v420_v23 = vld [vmem:[%s3059_s5 + $0x98] sm:$0xff] }
  0x17   :  { %292 = vmatpush.msra.mxu1 %v271_v25 }
  0x18   :  { %1472 = vmatpush.msra.mxu2 %v271_v25  ;;  %v418_v25 = vld [vmem:[%s3059_s5 + $0x88] sm:$0xff] }
  0x19   :  { %1437 = vmatmul.msk.f32.gmra.mxu0 %vm71_vm0, %v40_v6  ;;  %293 = vmatpush.msra.mxu1 %v270_v26 }
  0x1a   :  { %1473 = vmatpush.msra.mxu2 %v270_v26  ;;  %1451 = vmatmul.msk.f32.gmra.mxu3 %vm71_vm0, %v54_v30  ;;  %v416_v26 = vld [vmem:[%s3059_s5 + $0x78] sm:$0xff] }
  0x1b   :  { %294 = vmatpush.msra.mxu1 %v269_v27 }
  0x1c   :  { %1474 = vmatpush.msra.mxu2 %v269_v27  ;;  %v425_v27 = vld [vmem:[%s3059_s5 + $0xc0] sm:$0xff] }
  0x1d   :  { %295 = vmatpush.msra.mxu1 %v268_v29 }
  0x1e   :  { %1475 = vmatpush.msra.mxu2 %v268_v29  ;;  %v414_v29 = vld [vmem:[%s3059_s5 + $0x68] sm:$0xff] }
  0x1f   :  { %296 = vmatpush.msra.mxu1 %v267_v31 }
  0x20   :  { %1476 = vmatpush.msra.mxu2 %v267_v31 }
  0x21   :  { %1438 = vmatmul.msk.f32.gmra.mxu0 %vm71_vm0, %v41_v7  ;;  %297 = vmatpush.msra.mxu1 %v266_v32 }
  0x22   :  { %1477 = vmatpush.msra.mxu2 %v266_v32  ;;  %1452 = vmatmul.msk.f32.gmra.mxu3 %vm71_vm0, %v55_v36  ;;  %v412_v32 = vld [vmem:[%s3059_s5 + $0x58] sm:$0xff] }
  0x23   :  { %298 = vmatpush.msra.mxu1 %v265_v34  ;;  %v408_v36 = vld [vmem:[%s3059_s5 + $0x38] sm:$0xff] }
  0x24   :  { %1478 = vmatpush.msra.mxu2 %v265_v34  ;;  %v410_v34 = vld [vmem:[%s3059_s5 + $0x48] sm:$0xff] }
  0x25   :  { %299 = vmatpush.msra.mxu1 %v264_v35 }
  0x26   :  { %1479 = vmatpush.msra.mxu2 %v264_v35  ;;  %v423_v35 = vld [vmem:[%s3059_s5 + $0xb0] sm:$0xff] }
  0x29   :  { %1439 = vmatmul.msk.f32.gmra.mxu0 %vm71_vm0, %v42_v8 }
  0x2a   :  { %1453 = vmatmul.msk.f32.gmra.mxu3 %vm71_vm0, %v56_v38 }
  0x31   :  { %1440 = vmatmul.msk.f32.gmra.mxu0 %vm71_vm0, %v43_v9  ;;  %v431_v9 = vld [vmem:[%s3059_s5 + $0xf0] sm:$0xff] }
  0x32   :  { %1454 = vmatmul.msk.f32.gmra.mxu3 %vm71_vm0, %v57_v39  ;;  %439 = vmatpush.msrb.mxu2 %v431_v9 }
  0x34   :  { %440 = vmatpush.msrb.mxu2 %v429_v14 }
  0x36   :  { %441 = vmatpush.msrb.mxu2 %v427_v19 }
  0x38   :  { %442 = vmatpush.msrb.mxu2 %v425_v27 }
  0x39   :  { %1441 = vmatmul.msk.f32.gmra.mxu0 %vm71_vm0, %v44_v10  ;;  %v432_v10 = vld [vmem:[%s3059_s5 + $0xf8] sm:$0xff] }
  0x3a   :  { %1455 = vmatmul.msk.f32.gmra.mxu3 %vm71_vm0, %v58_v40  ;;  %443 = vmatpush.msrb.mxu2 %v423_v35  ;;  %v406_v40 = vld [vmem:[%s3059_s5 + $0x28] sm:$0xff] }
  0x3b   :  { %531 = vmatpush.msrb.mxu3 %v432_v10  ;;  %v409_v10 = vld [vmem:[%s3059_s5 + $0x40] sm:$0xff] }
  0x3d   :  { %532 = vmatpush.msrb.mxu3 %v430_v13 }
  0x3f   :  { %533 = vmatpush.msrb.mxu3 %v428_v15  ;;  %v407_v15 = vld [vmem:[%s3059_s5 + $0x30] sm:$0xff] }
  0x41   :  { %1442 = vmatmul.msk.f32.gmra.mxu0 %vm71_vm0, %v45_v11  ;;  %534 = vmatpush.msrb.mxu3 %v426_v17 }
  0x42   :  { %1456 = vmatmul.msk.f32.gmra.mxu3 %vm71_vm0, %v59_v44  ;;  %v421_v44 = vld [vmem:[%s3059_s5 + $0xa0] sm:$0xff] }
  0x43   :  { %535 = vmatpush.msrb.mxu3 %v424_v18  ;;  %444 = vmatpush.msrb.mxu2 %v421_v44 }
  0x45   :  { %536 = vmatpush.msrb.mxu3 %v422_v20 }
  0x47   :  { %537 = vmatpush.msrb.mxu3 %v420_v23 }
  0x49   :  { %1443 = vmatmul.msk.f32.gmra.mxu0 %vm71_vm0, %v46_v12  ;;  %538 = vmatpush.msrb.mxu3 %v418_v25  ;;  %v403_v25 = vld [vmem:[%s3059_s5 + $0x10] sm:$0xff] }
  0x4a   :  { %1457 = vmatmul.msk.f32.gmra.mxu3 %vm71_vm0, %v60_v48 }
  0x4b   :  { %539 = vmatpush.msrb.mxu3 %v416_v26 }
  0x4d   :  { %540 = vmatpush.msrb.mxu3 %v414_v29 }
  0x4f   :  { %541 = vmatpush.msrb.mxu3 %v412_v32 }
  0x51   :  { %1444 = vmatmul.msk.f32.gmra.mxu0 %vm71_vm0, %v47_v16  ;;  %542 = vmatpush.msrb.mxu3 %v410_v34 }
  0x52   :  { %1458 = vmatmul.msk.f32.gmra.mxu3 %vm71_vm0, %v61_v52 }
  0x53   :  { %543 = vmatpush.msrb.mxu3 %v408_v36 }
  0x55   :  { %544 = vmatpush.msrb.mxu3 %v406_v40 }
  0x59   :  { %1445 = vmatmul.msk.f32.gmra.mxu0 %vm71_vm0, %v48_v22 }
  0x5a   :  { %1459 = vmatmul.msk.f32.gmra.mxu3 %vm71_vm0, %v62_v56  ;;  %v415_v56 = vld [vmem:[%s3059_s5 + $0x70] sm:$0xff] }
  0x61   :  { %1446 = vmatmul.msk.f32.gmra.mxu0 %vm71_vm0, %v49_v28 }
  0x69   :  { %1447 = vmatmul.msk.f32.gmra.mxu0 %vm71_vm0, %v50_v33 }
  0x71   :  { %1448 = vmatmul.msk.f32.gmra.mxu0 %vm71_vm0, %v51_v37 }
  0x86   :  { %v164_v42 = vpop.f32.mrf.mxu0 }
  0x87   :  { %v165_v43 = vadd.f32 %v1740_v41, %v164_v42 }
  0x89   :  { %v239_v45 = vmax.f32 %v165_v43, 0.0  ;;  %v404_v43 = vld [vmem:[%s3059_s5 + $0x18] sm:$0xff] }
  0x8a   :  { %545 = vmatpush.msrb.mxu3 %v404_v43 }
  0x8b   :  { %300 = vmatmul.f32.vlgmr.msra.gmra.mxu1 %v239_v45  ;;  %v402_v45 = vld [vmem:[%s3059_s5 + $0x8] sm:$0xff] }
  0x8c   :  { %546 = vmatpush.msrb.mxu3 %v402_v45 }
  0x8d   :  { %v206_v28 = vpop.f32.mrf.mxu3 }
  0x8e   :  { %v167_v46 = vpop.f32.mrf.mxu0 }
  0x8f   :  { %v168_v47 = vadd.f32 %v1740_v41, %v167_v46 }
  0x91   :  { %v240_v49 = vmax.f32 %v168_v47, 0.0 }
  0x93   :  { %303 = vmatmul.f32.gmra.mxu1 %v240_v49 }
  0x95   :  { %v209_v38 = vpop.f32.mrf.mxu3 }
  0x96   :  { %v170_v50 = vpop.f32.mrf.mxu0 }
  0x97   :  { %v171_v51 = vadd.f32 %v1740_v41, %v170_v50  ;;  %v419_v50 = vld [vmem:[%s3059_s5 + $0x90] sm:$0xff] }
  0x98   :  { %445 = vmatpush.msrb.mxu2 %v419_v50 }
  0x99   :  { %v241_v53 = vmax.f32 %v171_v51, 0.0  ;;  %v207_v51 = vadd.f32 %v1740_v41, %v206_v28 }
  0x9b   :  { %306 = vmatmul.f32.gmra.mxu1 %v241_v53  ;;  %v253_v52 = vmax.f32 %v207_v51, 0.0  ;;  %v417_v53 = vld [vmem:[%s3059_s5 + $0x80] sm:$0xff]  ;;  %v702_v51 = vld [vmem:[%s3060_s7 + $0xe8] sm:$0xff] }
  0x9c   :  { %446 = vmatpush.msrb.mxu2 %v417_v53 }
  0x9d   :  { %v212_v48 = vpop.f32.mrf.mxu3 }
  0x9e   :  { %v173_v54 = vpop.f32.mrf.mxu0  ;;  %447 = vmatpush.msrb.mxu2 %v415_v56 }
  0x9f   :  { %v174_v55 = vadd.f32 %v1740_v41, %v173_v54 }
  0xa1   :  { %v242_v57 = vmax.f32 %v174_v55, 0.0  ;;  %v210_v55 = vadd.f32 %v1740_v41, %v209_v38  ;;  %v704_v38 = vld [vmem:[%s3060_s7 + $0xf8] sm:$0xff] }
  0xa3   :  { %309 = vmatmul.f32.gmra.mxu1 %v242_v57  ;;  %v254_v57 = vmax.f32 %v210_v55, 0.0 }
  0xa5   :  { %v215_v54 = vpop.f32.mrf.mxu3 }
  0xa6   :  { %v176_v58 = vpop.f32.mrf.mxu0 }
  0xa7   :  { %v177_v59 = vadd.f32 %v1740_v41, %v176_v58  ;;  %v213_v58 = vadd.f32 %v1740_v41, %v212_v48 }
  0xa9   :  { %v243_v60 = vmax.f32 %v177_v59, 0.0 }
  0xab   :  { %312 = vmatmul.f32.gmra.mxu1 %v243_v60  ;;  %v1853_v60 = vld [vmem:[%s3058_s4] ss:$0 sm:$0xff] }
  0xad   :  { %v218_v59 = vpop.f32.mrf.mxu3 }
  0xae   :  { %v179_v61 = vpop.f32.mrf.mxu0  ;;  %v219_v9 = vadd.f32 %v1740_v41, %v218_v59  ;;  %v703_v59 = vld [vmem:[%s3060_s7 + $0xf0] sm:$0xff] }
  0xaf   :  { %v180_v62 = vadd.f32 %v1740_v41, %v179_v61  ;;  %v413_v61 = vld [vmem:[%s3059_s5 + $0x60] sm:$0xff]  ;;  %743 = vmatpush.msrb.mxu0 %v703_v59 }
  0xb0   :  { %448 = vmatpush.msrb.mxu2 %v413_v61  ;;  %v700_v61 = vld [vmem:[%s3060_s7 + $0xd8] sm:$0xff] }
  0xb1   :  { %v244_v63 = vmax.f32 %v180_v62, 0.0  ;;  %v255_v62 = vmax.f32 %v213_v58, 0.0 }
  0xb3   :  { %315 = vmatmul.f32.gmra.mxu1 %v244_v63 }
  0xb6   :  { %v182_v0 = vpop.f32.mrf.mxu0 }
  0xb7   :  { %v183_v1 = vadd.f32 %v1740_v41, %v182_v0 }
  0xb9   :  { %v245_v2 = vmax.f32 %v183_v1, 0.0 }
  0xbb   :  { %318 = vmatmul.f32.gmra.mxu1 %v245_v2  ;;  %v216_v2 = vadd.f32 %v1740_v41, %v215_v54 }
  0xbe   :  { %v185_v3 = vpop.f32.mrf.mxu0 }
  0xbf   :  { %v186_v4 = vadd.f32 %v1740_v41, %v185_v3  ;;  %v411_v3 = vld [vmem:[%s3059_s5 + $0x50] sm:$0xff] }
  0xc0   :  { %449 = vmatpush.msrb.mxu2 %v411_v3 }
  0xc1   :  { %v246_v5 = vmax.f32 %v186_v4, 0.0  ;;  %v221_v4 = vpop.f32.mrf.mxu3 }
  0xc2   :  { %450 = vmatpush.msrb.mxu2 %v409_v10  ;;  %v222_v17 = vadd.f32 %v1740_v41, %v221_v4  ;;  %v735_v4 = vld [vmem:[%s3060_s7 + $0x1f0] sm:$0xff] }
  0xc3   :  { %321 = vmatmul.f32.gmra.mxu1 %v246_v5  ;;  %v256_v5 = vmax.f32 %v216_v2, 0.0  ;;  %v731_v10 = vld [vmem:[%s3060_s7 + $0x1d0] sm:$0xff] }
  0xc4   :  { %451 = vmatpush.msrb.mxu2 %v407_v15  ;;  %v258_v18 = vmax.f32 %v222_v17, 0.0  ;;  %835 = vmatpush.msrb.mxu1 %v735_v4  ;;  %v683_v4 = vld [vmem:[%s3060_s7 + $0x50] sm:$0xff] }
  0xc6   :  { %v188_v6 = vpop.f32.mrf.mxu0 }
  0xc7   :  { %v189_v7 = vadd.f32 %v1740_v41, %v188_v6 }
  0xc9   :  { %v247_v8 = vmax.f32 %v189_v7, 0.0  ;;  %v224_v13 = vpop.f32.mrf.mxu3 }
  0xcb   :  { %324 = vmatmul.f32.gmra.mxu1 %v247_v8 }
  0xce   :  { %v191_v11 = vpop.f32.mrf.mxu0 }
  0xcf   :  { %v192_v12 = vadd.f32 %v1740_v41, %v191_v11  ;;  %v257_v11 = vmax.f32 %v219_v9, 0.0 }
  0xd1   :  { %v248_v16 = vmax.f32 %v192_v12, 0.0 }
  0xd3   :  { %327 = vmatmul.f32.gmra.mxu1 %v248_v16 }
  0xd6   :  { %v194_v21 = vpop.f32.mrf.mxu0 }
  0xd7   :  { %v195_v22 = vadd.f32 %v1740_v41, %v194_v21  ;;  %v405_v21 = vld [vmem:[%s3059_s5 + $0x20] sm:$0xff] }
  0xd8   :  { %452 = vmatpush.msrb.mxu2 %v405_v21 }
  0xd9   :  { %v249_v24 = vmax.f32 %v195_v22, 0.0  ;;  %v227_v22 = vpop.f32.mrf.mxu3 }
  0xda   :  { %453 = vmatpush.msrb.mxu2 %v403_v25  ;;  %v695_v25 = vld [vmem:[%s3060_s7 + $0xb0] sm:$0xff] }
  0xdb   :  { %330 = vmatmul.f32.gmra.mxu1 %v249_v24  ;;  %v225_v24 = vadd.f32 %v1740_v41, %v224_v13  ;;  %v729_v13 = vld [vmem:[%s3060_s7 + $0x1c0] sm:$0xff] }
  0xdd   :  { %v259_v26 = vmax.f32 %v225_v24, 0.0  ;;  %v696_v24 = vld [vmem:[%s3060_s7 + $0xb8] sm:$0xff] }
  0xde   :  { %v197_v30 = vpop.f32.mrf.mxu0 }
  0xdf   :  { %v198_v31 = vadd.f32 %v1740_v41, %v197_v30  ;;  %v228_v30 = vadd.f32 %v1740_v41, %v227_v22  ;;  %v721_v22 = vld [vmem:[%s3060_s7 + $0x180] sm:$0xff] }
  0xe1   :  { %v250_v33 = vmax.f32 %v198_v31, 0.0  ;;  %v401_v31 = vld [vmem:[%s3059_s5] sm:$0xff]  ;;  %v230_v32 = vpop.f32.mrf.mxu3 }
  0xe2   :  { %454 = vmatpush.msrb.mxu2 %v401_v31  ;;  %v711_v31 = vld [vmem:[%s3060_s7 + $0x130] sm:$0xff] }
  0xe3   :  { %333 = vmatmul.f32.gmra.mxu1 %v250_v33  ;;  %v260_v33 = vmax.f32 %v228_v30, 0.0  ;;  %v713_v30 = vld [vmem:[%s3060_s7 + $0x140] sm:$0xff] }
  0xe6   :  { %v200_v37 = vpop.f32.mrf.mxu0 }
  0xe7   :  { %v201_v39 = vadd.f32 %v1740_v41, %v200_v37  ;;  %v231_v37 = vadd.f32 %v1740_v41, %v230_v32 }
  0xe9   :  { %v251_v42 = vmax.f32 %v201_v39, 0.0  ;;  %v736_v39 = vld [vmem:[%s3060_s7 + $0x1f8] sm:$0xff]  ;;  %v233_v40 = vpop.f32.mrf.mxu3 }
  0xea   :  { %1019 = vmatpush.msra.mxu3 %v736_v39  ;;  %v705_v39 = vld [vmem:[%s3060_s7 + $0x100] sm:$0xff] }
  0xeb   :  { %336 = vmatmul.f32.vlgmr.msra.gmra.mxu2 %v251_v42  ;;  %v261_v42 = vmax.f32 %v231_v37, 0.0  ;;  %v707_v37 = vld [vmem:[%s3060_s7 + $0x110] sm:$0xff] }
  0xec   :  { %927 = vmatpush.msra.mxu2 %v704_v38  ;;  %v694_v38 = vld [vmem:[%s3060_s7 + $0xa8] sm:$0xff] }
  0xee   :  { %v203_v46 = vpop.f32.mrf.mxu0  ;;  %928 = vmatpush.msra.mxu2 %v702_v51  ;;  %v692_v51 = vld [vmem:[%s3060_s7 + $0x98] sm:$0xff] }
  0xef   :  { %v204_v47 = vadd.f32 %v1740_v41, %v203_v46  ;;  %v234_v46 = vadd.f32 %v1740_v41, %v233_v40  ;;  %v726_v40 = vld [vmem:[%s3060_s7 + $0x1a8] sm:$0xff] }
  0xf0   :  { %929 = vmatpush.msra.mxu2 %v700_v61  ;;  %v722_v61 = vld [vmem:[%s3060_s7 + $0x188] sm:$0xff] }
  0xf1   :  { %v252_v49 = vmax.f32 %v204_v47, 0.0  ;;  %v262_v47 = vmax.f32 %v234_v46, 0.0  ;;  %v689_v46 = vld [vmem:[%s3060_s7 + $0x80] sm:$0xff] }
  0xf3   :  { %339 = vmatmul.f32.gmra.mxu2 %v252_v49  ;;  %v236_v49 = vpop.f32.mrf.mxu3 }
  0xf4   :  { %v237_v54 = vadd.f32 %v1740_v41, %v236_v49  ;;  %v732_v41 = vld [vmem:[%s3060_s7 + $0x1d8] sm:$0xff] }
  0xf6   :  { %v263_v55 = vmax.f32 %v237_v54, 0.0 }
  0xfb   :  { %342 = vmatmul.f32.gmra.mxu2 %v253_v52  ;;  %v734_v52 = vld [vmem:[%s3060_s7 + $0x1e8] sm:$0xff] }
  0xfc   :  { %1020 = vmatpush.msra.mxu3 %v734_v52 }
  0xfe   :  { %1021 = vmatpush.msra.mxu3 %v732_v41 }
 0x103   :  { %345 = vmatmul.f32.gmra.mxu2 %v254_v57 }
 0x108   :  { %v301_v63 = vpop.f32.mrf.mxu1 }
 0x109   :  { %v1859_v0 = vadd.f32 %v1853_v60, %v301_v63 }
 0x10b   :  { %v376_v1 = vmax.f32 %v1859_v0, 0.0  ;;  %348 = vmatmul.f32.gmra.mxu2 %v255_v62  ;;  %v701_v62 = vld [vmem:[%s3060_s7 + $0xe0] sm:$0xff]  ;;  %v699_v0 = vld [vmem:[%s3060_s7 + $0xd0] sm:$0xff] }
 0x10c   :  { %744 = vmatpush.msrb.mxu0 %v701_v62 }
 0x10d   :  { %547 = vmatmul.f32.vlgmr.msrb.gmra.mxu3 %v376_v1 }
 0x10e   :  { %745 = vmatpush.msrb.mxu0 %v699_v0 }
 0x110   :  { %v304_v6 = vpop.f32.mrf.mxu1 }
 0x111   :  { %v1869_v7 = vadd.f32 %v1853_v60, %v304_v6 }
 0x113   :  { %351 = vmatmul.f32.gmra.mxu2 %v256_v5  ;;  %v377_v8 = vmax.f32 %v1869_v7, 0.0  ;;  %v733_v5 = vld [vmem:[%s3060_s7 + $0x1e0] sm:$0xff]  ;;  %v727_v7 = vld [vmem:[%s3060_s7 + $0x1b0] sm:$0xff] }
 0x114   :  { %836 = vmatpush.msrb.mxu1 %v733_v5 }
 0x115   :  { %550 = vmatmul.f32.gmra.mxu3 %v377_v8 }
 0x116   :  { %837 = vmatpush.msrb.mxu1 %v731_v10 }
 0x118   :  { %v307_v12 = vpop.f32.mrf.mxu1  ;;  %838 = vmatpush.msrb.mxu1 %v729_v13  ;;  %v720_v13 = vld [vmem:[%s3060_s7 + $0x178] sm:$0xff] }
 0x119   :  { %v1879_v14 = vadd.f32 %v1853_v60, %v307_v12  ;;  %v730_v12 = vld [vmem:[%s3060_s7 + $0x1c8] sm:$0xff] }
 0x11a   :  { %1022 = vmatpush.msra.mxu3 %v730_v12  ;;  %839 = vmatpush.msrb.mxu1 %v727_v7 }
 0x11b   :  { %354 = vmatmul.f32.gmra.mxu2 %v257_v11  ;;  %v378_v16 = vmax.f32 %v1879_v14, 0.0  ;;  %v719_v14 = vld [vmem:[%s3060_s7 + $0x170] sm:$0xff] }
 0x11d   :  { %553 = vmatmul.f32.gmra.mxu3 %v378_v16 }
 0x120   :  { %v310_v19 = vpop.f32.mrf.mxu1 }
 0x121   :  { %v1889_v20 = vadd.f32 %v1853_v60, %v310_v19  ;;  %v723_v19 = vld [vmem:[%s3060_s7 + $0x190] sm:$0xff] }
 0x123   :  { %357 = vmatmul.f32.gmra.mxu2 %v258_v18  ;;  %v379_v23 = vmax.f32 %v1889_v20, 0.0  ;;  %v697_v18 = vld [vmem:[%s3060_s7 + $0xc0] sm:$0xff] }
 0x124   :  { %746 = vmatpush.msrb.mxu0 %v697_v18  ;;  %v709_v20 = vld [vmem:[%s3060_s7 + $0x120] sm:$0xff] }
 0x125   :  { %556 = vmatmul.f32.gmra.mxu3 %v379_v23 }
 0x126   :  { %747 = vmatpush.msrb.mxu0 %v695_v25 }
 0x128   :  { %v313_v27 = vpop.f32.mrf.mxu1 }
 0x129   :  { %v1902_v28 = vadd.f32 %v1853_v60, %v313_v27  ;;  %v715_v27 = vld [vmem:[%s3060_s7 + $0x150] sm:$0xff] }
 0x12b   :  { %360 = vmatmul.f32.gmra.mxu2 %v259_v26  ;;  %v380_v29 = vmax.f32 %v1902_v28, 0.0  ;;  %v728_v26 = vld [vmem:[%s3060_s7 + $0x1b8] sm:$0xff]  ;;  %v691_v28 = vld [vmem:[%s3060_s7 + $0x90] sm:$0xff] }
 0x12c   :  { %1023 = vmatpush.msra.mxu3 %v728_v26  ;;  %v677_v26 = vld [vmem:[%s3060_s7 + $0x20] sm:$0xff] }
 0x12d   :  { %559 = vmatmul.f32.gmra.mxu3 %v380_v29 }
 0x12e   :  { %1024 = vmatpush.msra.mxu3 %v726_v40 }
 0x130   :  { %v316_v34 = vpop.f32.mrf.mxu1 }
 0x131   :  { %v1912_v35 = vadd.f32 %v1853_v60, %v316_v34  ;;  %v693_v34 = vld [vmem:[%s3060_s7 + $0xa0] sm:$0xff] }
 0x132   :  { %748 = vmatpush.msrb.mxu0 %v693_v34 }
 0x133   :  { %363 = vmatmul.f32.gmra.mxu2 %v260_v33  ;;  %v381_v36 = vmax.f32 %v1912_v35, 0.0  ;;  %v724_v35 = vld [vmem:[%s3060_s7 + $0x198] sm:$0xff] }
 0x134   :  { %749 = vmatpush.msrb.mxu0 %v691_v28  ;;  %1025 = vmatpush.msra.mxu3 %v724_v35  ;;  %v673_v28 = vld [vmem:[%s3060_s7] sm:$0xff] }
 0x135   :  { %562 = vmatmul.f32.gmra.mxu3 %v381_v36 }
 0x136   :  { %750 = vmatpush.msrb.mxu0 %v689_v46  ;;  %1026 = vmatpush.msra.mxu3 %v722_v61  ;;  %v682_v61 = vld [vmem:[%s3060_s7 + $0x48] sm:$0xff] }
 0x138   :  { %v319_v43 = vpop.f32.mrf.mxu1  ;;  %1027 = vmatpush.msra.mxu3 %v720_v13 }
 0x139   :  { %v1925_v44 = vadd.f32 %v1853_v60, %v319_v43 }
 0x13b   :  { %366 = vmatmul.f32.gmra.mxu2 %v261_v42  ;;  %v382_v45 = vmax.f32 %v1925_v44, 0.0  ;;  %v2115_v44 = vld [vmem:[%s3061_s6] sm:$0x3] }
 0x13c   :  { %v2125_v59 = vperm.slane %v2115_v44, 1 }
 0x13d   :  { %565 = vmatmul.f32.gmra.mxu3 %v382_v45 }
 0x140   :  { %v322_v48 = vpop.f32.mrf.mxu1 }
 0x141   :  { %v1932_v50 = vadd.f32 %v1853_v60, %v322_v48 }
 0x143   :  { %369 = vmatmul.f32.gmra.mxu2 %v262_v47  ;;  %v383_v53 = vmax.f32 %v1932_v50, 0.0 }
 0x145   :  { %568 = vmatmul.f32.gmra.mxu3 %v383_v53 }
 0x148   :  { %v325_v56 = vpop.f32.mrf.mxu1 }
 0x149   :  { %v1945_v57 = vadd.f32 %v1853_v60, %v325_v56  ;;  %v685_v56 = vld [vmem:[%s3060_s7 + $0x60] sm:$0xff] }
 0x14b   :  { %372 = vmatmul.f32.gmra.mxu2 %v263_v55  ;;  %v384_v58 = vmax.f32 %v1945_v57, 0.0  ;;  %v688_v57 = vld [vmem:[%s3060_s7 + $0x78] sm:$0xff] }
 0x14d   :  { %571 = vmatmul.f32.gmra.mxu3 %v384_v58 }
 0x150   :  { %v328_v63 = vpop.f32.mrf.mxu1 }
 0x151   :  { %v1963_v2 = vadd.f32 %v1853_v60, %v328_v63 }
 0x153   :  { %455 = vmatmul.f32.vlgmr.msrb.gmra.mxu2 %v376_v1  ;;  %v385_v3 = vmax.f32 %v1963_v2, 0.0  ;;  %v698_v1 = vld [vmem:[%s3060_s7 + $0xc8] sm:$0xff]  ;;  %v679_v2 = vld [vmem:[%s3060_s7 + $0x30] sm:$0xff] }
 0x154   :  { %930 = vmatpush.msra.mxu2 %v698_v1 }
 0x155   :  { %574 = vmatmul.f32.gmra.mxu3 %v385_v3 }
 0x156   :  { %931 = vmatpush.msra.mxu2 %v696_v24  ;;  %v686_v24 = vld [vmem:[%s3060_s7 + $0x68] sm:$0xff] }
 0x158   :  { %v331_v6 = vpop.f32.mrf.mxu1  ;;  %932 = vmatpush.msra.mxu2 %v694_v38  ;;  %v684_v38 = vld [vmem:[%s3060_s7 + $0x58] sm:$0xff] }
 0x159   :  { %v1977_v9 = vadd.f32 %v1853_v60, %v331_v6 }
 0x15a   :  { %933 = vmatpush.msra.mxu2 %v692_v51 }
 0x15b   :  { %458 = vmatmul.f32.gmra.mxu2 %v377_v8  ;;  %v386_v11 = vmax.f32 %v1977_v9, 0.0  ;;  %v725_v8 = vld [vmem:[%s3060_s7 + $0x1a0] sm:$0xff] }
 0x15c   :  { %840 = vmatpush.msrb.mxu1 %v725_v8 }
 0x15d   :  { %577 = vmatmul.f32.gmra.mxu3 %v386_v11 }
 0x15e   :  { %841 = vmatpush.msrb.mxu1 %v723_v19 }
 0x160   :  { %v334_v15 = vpop.f32.mrf.mxu1  ;;  %842 = vmatpush.msrb.mxu1 %v721_v22 }
 0x161   :  { %v2006_v17 = vadd.f32 %v1853_v60, %v334_v15 }
 0x162   :  { %843 = vmatpush.msrb.mxu1 %v719_v14 }
 0x163   :  { %461 = vmatmul.f32.gmra.mxu2 %v378_v16  ;;  %v387_v21 = vmax.f32 %v2006_v17, 0.0  ;;  %v717_v16 = vld [vmem:[%s3060_s7 + $0x160] sm:$0xff]  ;;  %v716_v17 = vld [vmem:[%s3060_s7 + $0x158] sm:$0xff] }
 0x164   :  { %844 = vmatpush.msrb.mxu1 %v717_v16 }
 0x165   :  { %580 = vmatmul.f32.gmra.mxu3 %v387_v21 }
 0x166   :  { %845 = vmatpush.msrb.mxu1 %v715_v27  ;;  %v718_v27 = vld [vmem:[%s3060_s7 + $0x168] sm:$0xff] }
 0x167   :  { %1028 = vmatpush.msra.mxu3 %v718_v27 }
 0x168   :  { %846 = vmatpush.msrb.mxu1 %v713_v30 }
 0x169   :  { %1029 = vmatpush.msra.mxu3 %v716_v17 }
 0x16a   :  { %847 = vmatpush.msrb.mxu1 %v711_v31  ;;  %v675_v31 = vld [vmem:[%s3060_s7 + $0x10] sm:$0xff] }
 0x16b   :  { %464 = vmatmul.f32.gmra.mxu2 %v379_v23 }
 0x16c   :  { %848 = vmatpush.msrb.mxu1 %v709_v20 }
 0x16e   :  { %v337_v32 = vpop.f32.mrf.mxu2  ;;  %849 = vmatpush.msrb.mxu1 %v707_v37 }
 0x16f   :  { %v2049_v33 = vadd.f32 %v1853_v60, %v337_v32 }
 0x170   :  { %850 = vmatpush.msrb.mxu1 %v705_v39  ;;  %v714_v39 = vld [vmem:[%s3060_s7 + $0x148] sm:$0xff] }
 0x171   :  { %v388_v23 = vmax.f32 %v2049_v33, 0.0  ;;  %1030 = vmatpush.msra.mxu3 %v714_v39  ;;  %v710_v33 = vld [vmem:[%s3060_s7 + $0x128] sm:$0xff] }
 0x173   :  { %467 = vmatmul.f32.gmra.mxu2 %v380_v29  ;;  %583 = vmatmul.f32.gmra.mxu3 %v388_v23 }
 0x176   :  { %v340_v29 = vpop.f32.mrf.mxu2 }
 0x177   :  { %v2078_v42 = vadd.f32 %v1853_v60, %v340_v29  ;;  %v712_v29 = vld [vmem:[%s3060_s7 + $0x138] sm:$0xff] }
 0x178   :  { %1031 = vmatpush.msra.mxu3 %v712_v29 }
 0x179   :  { %v389_v43 = vmax.f32 %v2078_v42, 0.0  ;;  %v1192_v42 = vld [vmem:[%s3062_s9 + $0xf8] sm:$0xff] }
 0x17a   :  { %1032 = vmatpush.msra.mxu3 %v710_v33  ;;  %1289 = vmatpush.msra.mxu1 %v1192_v42  ;;  %v674_v42 = vld [vmem:[%s3060_s7 + $0x8] sm:$0xff] }
 0x17b   :  { %470 = vmatmul.f32.gmra.mxu2 %v381_v36  ;;  %586 = vmatmul.f32.gmra.mxu3 %v389_v43  ;;  %v687_v36 = vld [vmem:[%s3060_s7 + $0x70] sm:$0xff] }
 0x17c   :  { %751 = vmatpush.msrb.mxu0 %v687_v36 }
 0x17e   :  { %v343_v47 = vpop.f32.mrf.mxu2  ;;  %752 = vmatpush.msrb.mxu0 %v685_v56 }
 0x17f   :  { %v2089_v48 = vadd.f32 %v1853_v60, %v343_v47  ;;  %v708_v47 = vld [vmem:[%s3060_s7 + $0x118] sm:$0xff] }
 0x180   :  { %753 = vmatpush.msrb.mxu0 %v683_v4  ;;  %1033 = vmatpush.msra.mxu3 %v708_v47  ;;  %v1189_v47 = vld [vmem:[%s3062_s9 + $0xe0] sm:$0xff] }
 0x181   :  { %v390_v49 = vmax.f32 %v2089_v48, 0.0  ;;  %v1175_v48 = vld [vmem:[%s3062_s9 + $0x70] sm:$0xff] }
 0x183   :  { %473 = vmatmul.f32.gmra.mxu2 %v382_v45  ;;  %589 = vmatmul.f32.gmra.mxu3 %v390_v49  ;;  %v690_v45 = vld [vmem:[%s3060_s7 + $0x88] sm:$0xff] }
 0x184   :  { %934 = vmatpush.msra.mxu2 %v690_v45  ;;  %v1176_v45 = vld [vmem:[%s3062_s9 + $0x78] sm:$0xff] }
 0x186   :  { %v346_v52 = vpop.f32.mrf.mxu2  ;;  %935 = vmatpush.msra.mxu2 %v688_v57 }
 0x187   :  { %v2106_v54 = vadd.f32 %v1853_v60, %v346_v52  ;;  %v706_v52 = vld [vmem:[%s3060_s7 + $0x108] sm:$0xff] }
 0x188   :  { %936 = vmatpush.msra.mxu2 %v686_v24  ;;  %1034 = vmatpush.msra.mxu3 %v706_v52 }
 0x189   :  { %v391_v55 = vmax.f32 %v2106_v54, 0.0 }
 0x18a   :  { %937 = vmatpush.msra.mxu2 %v684_v38  ;;  %v1190_v38 = vld [vmem:[%s3062_s9 + $0xe8] sm:$0xff] }
 0x18b   :  { %476 = vmatmul.f32.gmra.mxu2 %v383_v53  ;;  %592 = vmatmul.f32.gmra.mxu3 %v391_v55 }
 0x18c   :  { %938 = vmatpush.msra.mxu2 %v682_v61 }
 0x18e   :  { %v349_v41 = vpop.f32.mrf.mxu2 }
 0x18f   :  { %v2131_v50 = vadd.f32 %v1853_v60, %v349_v41 }
 0x190   :  { %v548_v53 = vpop.f32.mrf.mxu3 }
 0x191   :  { %v392_v62 = vmax.f32 %v2131_v50, 0.0  ;;  %v2135_v63 = vadd.f32 %v548_v53, %v2125_v59 }
 0x193   :  { %v624_v5 = vmax.f32 %v2135_v63, 0.0  ;;  %479 = vmatmul.f32.gmra.mxu2 %v384_v58  ;;  %595 = vmatmul.f32.gmra.mxu3 %v392_v62  ;;  %v681_v58 = vld [vmem:[%s3060_s7 + $0x40] sm:$0xff]  ;;  %v676_v63 = vld [vmem:[%s3060_s7 + $0x18] sm:$0xff] }
 0x194   :  { %754 = vmatpush.msrb.mxu0 %v681_v58 }
 0x195   :  { %851 = vmatmul.f32.vlgmr.msrb.gmra.mxu1 %v624_v5 }
 0x196   :  { %v352_v6 = vpop.f32.mrf.mxu2  ;;  %755 = vmatpush.msrb.mxu0 %v679_v2  ;;  %v1191_v2 = vld [vmem:[%s3062_s9 + $0xf0] sm:$0xff] }
 0x197   :  { %v2148_v0 = vadd.f32 %v1853_v60, %v352_v6  ;;  %1290 = vmatpush.msra.mxu1 %v1191_v2 }
 0x198   :  { %v551_v1 = vpop.f32.mrf.mxu3  ;;  %756 = vmatpush.msrb.mxu0 %v677_v26 }
 0x199   :  { %v393_v10 = vmax.f32 %v2148_v0, 0.0  ;;  %v2152_v12 = vadd.f32 %v551_v1, %v2125_v59  ;;  %1291 = vmatpush.msra.mxu1 %v1190_v38 }
 0x19a   :  { %757 = vmatpush.msrb.mxu0 %v675_v31 }
 0x19b   :  { %482 = vmatmul.f32.gmra.mxu2 %v385_v3  ;;  %598 = vmatmul.f32.gmra.mxu3 %v393_v10  ;;  %v626_v7 = vmax.f32 %v2152_v12, 0.0 }
 0x19c   :  { %758 = vmatpush.msrb.mxu0 %v673_v28  ;;  %1292 = vmatpush.msra.mxu1 %v1189_v47 }
 0x19d   :  { %854 = vmatmul.f32.gmra.mxu1 %v626_v7 }
 0x19e   :  { %v355_v8 = vpop.f32.mrf.mxu2  ;;  %1197 = vmatpush.msra.mxu0 %v1176_v45 }
 0x19f   :  { %v2171_v15 = vadd.f32 %v1853_v60, %v355_v8 }
 0x1a0   :  { %v554_v18 = vpop.f32.mrf.mxu3  ;;  %1198 = vmatpush.msra.mxu0 %v1175_v48 }
 0x1a1   :  { %v394_v19 = vmax.f32 %v2171_v15, 0.0  ;;  %v2175_v22 = vadd.f32 %v554_v18, %v2125_v59 }
 0x1a3   :  { %485 = vmatmul.f32.gmra.mxu2 %v386_v11  ;;  %601 = vmatmul.f32.gmra.mxu3 %v394_v19  ;;  %v628_v3 = vmax.f32 %v2175_v22, 0.0  ;;  %v1188_v22 = vld [vmem:[%s3062_s9 + $0xd8] sm:$0xff] }
 0x1a4   :  { %1293 = vmatpush.msra.mxu1 %v1188_v22 }
 0x1a5   :  { %857 = vmatmul.f32.gmra.mxu1 %v628_v3 }
 0x1a6   :  { %v358_v14 = vpop.f32.mrf.mxu2 }
 0x1a7   :  { %v2191_v16 = vadd.f32 %v1853_v60, %v358_v14 }
 0x1a8   :  { %v557_v25 = vpop.f32.mrf.mxu3 }
 0x1a9   :  { %v395_v9 = vmax.f32 %v2191_v16, 0.0  ;;  %v2195_v11 = vadd.f32 %v557_v25, %v2125_v59 }
 0x1ab   :  { %488 = vmatmul.f32.gmra.mxu2 %v387_v21  ;;  %604 = vmatmul.f32.gmra.mxu3 %v395_v9  ;;  %v630_v30 = vmax.f32 %v2195_v11, 0.0  ;;  %v1187_v11 = vld [vmem:[%s3062_s9 + $0xd0] sm:$0xff] }
 0x1ac   :  { %1294 = vmatpush.msra.mxu1 %v1187_v11 }
 0x1ad   :  { %860 = vmatmul.f32.gmra.mxu1 %v630_v30 }
 0x1ae   :  { %v361_v32 = vpop.f32.mrf.mxu2 }
 0x1af   :  { %v2214_v20 = vadd.f32 %v1853_v60, %v361_v32 }
 0x1b0   :  { %v560_v21 = vpop.f32.mrf.mxu3 }
 0x1b1   :  { %v396_v34 = vmax.f32 %v2214_v20, 0.0  ;;  %v2221_v37 = vadd.f32 %v560_v21, %v2125_v59  ;;  %v1171_v20 = vld [vmem:[%s3062_s9 + $0x50] sm:$0xff] }
 0x1b3   :  { %491 = vmatmul.f32.gmra.mxu2 %v388_v23  ;;  %607 = vmatmul.f32.gmra.mxu3 %v396_v34  ;;  %v632_v40 = vmax.f32 %v2221_v37, 0.0 }
 0x1b5   :  { %863 = vmatmul.f32.gmra.mxu1 %v632_v40 }
 0x1b6   :  { %v364_v23 = vpop.f32.mrf.mxu2 }
 0x1b7   :  { %v2246_v46 = vadd.f32 %v1853_v60, %v364_v23 }
 0x1b8   :  { %v563_v51 = vpop.f32.mrf.mxu3 }
 0x1b9   :  { %v397_v35 = vmax.f32 %v2246_v46, 0.0  ;;  %v2253_v36 = vadd.f32 %v563_v51, %v2125_v59 }
 0x1bb   :  { %494 = vmatmul.f32.gmra.mxu2 %v389_v43  ;;  %610 = vmatmul.f32.gmra.mxu3 %v397_v35  ;;  %v634_v56 = vmax.f32 %v2253_v36, 0.0  ;;  %v1186_v36 = vld [vmem:[%s3062_s9 + $0xc8] sm:$0xff] }
 0x1bc   :  { %1295 = vmatpush.msra.mxu1 %v1186_v36  ;;  %v1165_v36 = vld [vmem:[%s3062_s9 + $0x20] sm:$0xff] }
 0x1bd   :  { %866 = vmatmul.f32.gmra.mxu1 %v634_v56 }
 0x1be   :  { %v367_v43 = vpop.f32.mrf.mxu2 }
 0x1bf   :  { %v2275_v41 = vadd.f32 %v1853_v60, %v367_v43 }
 0x1c0   :  { %v566_v53 = vpop.f32.mrf.mxu3 }
 0x1c1   :  { %v398_v4 = vmax.f32 %v2275_v41, 0.0  ;;  %v2279_v6 = vadd.f32 %v566_v53, %v2125_v59 }
 0x1c3   :  { %497 = vmatmul.f32.gmra.mxu2 %v390_v49  ;;  %613 = vmatmul.f32.gmra.mxu3 %v398_v4  ;;  %v636_v1 = vmax.f32 %v2279_v6, 0.0  ;;  %v680_v49 = vld [vmem:[%s3060_s7 + $0x38] sm:$0xff]  ;;  %v1169_v6 = vld [vmem:[%s3062_s9 + $0x40] sm:$0xff] }
 0x1c4   :  { %939 = vmatpush.msra.mxu2 %v680_v49 }
 0x1c5   :  { %869 = vmatmul.f32.gmra.mxu1 %v636_v1 }
 0x1c6   :  { %v370_v57 = vpop.f32.mrf.mxu2 }
 0x1c7   :  { %v2289_v58 = vadd.f32 %v1853_v60, %v370_v57 }
 0x1c8   :  { %v569_v13 = vpop.f32.mrf.mxu3 }
 0x1c9   :  { %v399_v8 = vmax.f32 %v2289_v58, 0.0  ;;  %v2293_v18 = vadd.f32 %v569_v13, %v2125_v59 }
 0x1cb   :  { %500 = vmatmul.f32.gmra.mxu2 %v391_v55  ;;  %616 = vmatmul.f32.gmra.mxu3 %v399_v8  ;;  %v638_v24 = vmax.f32 %v2293_v18, 0.0  ;;  %v2324_v55 = vperm.slane %v2115_v44, 0  ;;  %v678_v44 = vld [vmem:[%s3060_s7 + $0x28] sm:$0xff] }
 0x1cc   :  { %940 = vmatpush.msra.mxu2 %v678_v44 }
 0x1cd   :  { %872 = vmatmul.f32.gmra.mxu1 %v638_v24 }
 0x1ce   :  { %v373_v14 = vpop.f32.mrf.mxu2  ;;  %941 = vmatpush.msra.mxu2 %v676_v63 }
 0x1cf   :  { %v2312_v25 = vadd.f32 %v1853_v60, %v373_v14  ;;  %v1174_v60 = vld [vmem:[%s3062_s9 + $0x68] sm:$0xff] }
 0x1d0   :  { %v572_v26 = vpop.f32.mrf.mxu3  ;;  %1199 = vmatpush.msra.mxu0 %v1174_v60  ;;  %942 = vmatpush.msra.mxu2 %v674_v42  ;;  %v1170_v60 = vld [vmem:[%s3062_s9 + $0x48] sm:$0xff] }
 0x1d1   :  { %v400_v27 = vmax.f32 %v2312_v25, 0.0  ;;  %v2316_v31 = vadd.f32 %v572_v26, %v2125_v59 }
 0x1d3   :  { %503 = vmatmul.f32.gmra.mxu2 %v392_v62  ;;  %619 = vmatmul.f32.gmra.mxu3 %v400_v27  ;;  %v640_v54 = vmax.f32 %v2316_v31, 0.0  ;;  %v1184_v31 = vld [vmem:[%s3062_s9 + $0xb8] sm:$0xff] }
 0x1d5   :  { %875 = vmatmul.f32.gmra.mxu1 %v640_v54 }
 0x1d6   :  { %v456_v32 = vpop.f32.mrf.mxu2 }
 0x1d7   :  { %v2332_v50 = vadd.f32 %v456_v32, %v2324_v55 }
 0x1d8   :  { %v575_v62 = vpop.f32.mrf.mxu3 }
 0x1d9   :  { %v623_v17 = vmax.f32 %v2332_v50, 0.0  ;;  %v2336_v21 = vadd.f32 %v575_v62, %v2125_v59  ;;  %v1168_v50 = vld [vmem:[%s3062_s9 + $0x38] sm:$0xff] }
 0x1db   :  { %506 = vmatmul.f32.gmra.mxu2 %v393_v10  ;;  %759 = vmatmul.f32.vlgmr.msrb.gmra.mxu0 %v623_v17  ;;  %v642_v39 = vmax.f32 %v2336_v21, 0.0  ;;  %v1173_v10 = vld [vmem:[%s3062_s9 + $0x60] sm:$0xff]  ;;  %v1167_v21 = vld [vmem:[%s3062_s9 + $0x30] sm:$0xff] }
 0x1dc   :  { %1035 = vmatmul.f32.vlgmr.msra.gmra.mxu3 %v624_v5  ;;  %1200 = vmatpush.msra.mxu0 %v1173_v10 }
 0x1dd   :  { %878 = vmatmul.f32.gmra.mxu1 %v642_v39 }
 0x1de   :  { %v459_v28 = vpop.f32.mrf.mxu2 }
 0x1df   :  { %v2354_v29 = vadd.f32 %v459_v28, %v2324_v55 }
 0x1e0   :  { %v578_v33 = vpop.f32.mrf.mxu3 }
 0x1e1   :  { %v2357_v23 = vadd.f32 %v578_v33, %v2125_v59  ;;  %v625_v0 = vmax.f32 %v2354_v29, 0.0 }
 0x1e3   :  { %509 = vmatmul.f32.gmra.mxu2 %v394_v19  ;;  %762 = vmatmul.f32.gmra.mxu0 %v625_v0  ;;  %v644_v5 = vmax.f32 %v2357_v23, 0.0  ;;  %v1183_v23 = vld [vmem:[%s3062_s9 + $0xb0] sm:$0xff] }
 0x1e4   :  { %1038 = vmatmul.f32.gmra.mxu3 %v626_v7  ;;  %v1172_v7 = vld [vmem:[%s3062_s9 + $0x58] sm:$0xff] }
 0x1e5   :  { %881 = vmatmul.f32.gmra.mxu1 %v644_v5  ;;  %1201 = vmatpush.msra.mxu0 %v1172_v7 }
 0x1e6   :  { %v462_v51 = vpop.f32.mrf.mxu2 }
 0x1e7   :  { %v2379_v15 = vadd.f32 %v462_v51, %v2324_v55  ;;  %1202 = vmatpush.msra.mxu0 %v1171_v20 }
 0x1e8   :  { %v581_v19 = vpop.f32.mrf.mxu3 }
 0x1e9   :  { %v2382_v52 = vadd.f32 %v581_v19, %v2125_v59  ;;  %v627_v45 = vmax.f32 %v2379_v15, 0.0  ;;  %1203 = vmatpush.msra.mxu0 %v1170_v60 }
 0x1eb   :  { %512 = vmatmul.f32.gmra.mxu2 %v395_v9  ;;  %765 = vmatmul.f32.gmra.mxu0 %v627_v45  ;;  %v646_v12 = vmax.f32 %v2382_v52, 0.0  ;;  %v1166_v52 = vld [vmem:[%s3062_s9 + $0x28] sm:$0xff] }
 0x1ec   :  { %1041 = vmatmul.f32.gmra.mxu3 %v628_v3  ;;  %1204 = vmatpush.msra.mxu0 %v1169_v6 }
 0x1ed   :  { %884 = vmatmul.f32.gmra.mxu1 %v646_v12 }
 0x1ee   :  { %v465_v61 = vpop.f32.mrf.mxu2  ;;  %1205 = vmatpush.msra.mxu0 %v1168_v50 }
 0x1ef   :  { %v2398_v16 = vadd.f32 %v465_v61, %v2324_v55 }
 0x1f0   :  { %1206 = vmatpush.msra.mxu0 %v1167_v21 }
 0x1f1   :  { %v629_v9 = vmax.f32 %v2398_v16, 0.0 }
 0x1f2   :  { %1207 = vmatpush.msra.mxu0 %v1166_v52 }
 0x1f3   :  { %515 = vmatmul.f32.gmra.mxu2 %v396_v34  ;;  %768 = vmatmul.f32.gmra.mxu0 %v629_v9 }
 0x1f4   :  { %1044 = vmatmul.f32.gmra.mxu3 %v630_v30  ;;  %1208 = vmatpush.msra.mxu0 %v1165_v36 }
 0x1f6   :  { %v468_v3 = vpop.f32.mrf.mxu2  ;;  %v584_v43 = vpop.f32.mrf.mxu3 }
 0x1f7   :  { %v2414_v53 = vadd.f32 %v468_v3, %v2324_v55  ;;  %v2417_v57 = vadd.f32 %v584_v43, %v2125_v59 }
 0x1f9   :  { %v648_v13 = vmax.f32 %v2417_v57, 0.0  ;;  %v631_v48 = vmax.f32 %v2414_v53, 0.0 }
 0x1fb   :  { %518 = vmatmul.f32.gmra.mxu2 %v397_v35  ;;  %771 = vmatmul.f32.gmra.mxu0 %v631_v48 }
 0x1fc   :  { %887 = vmatmul.f32.gmra.mxu1 %v648_v13  ;;  %1047 = vmatmul.f32.gmra.mxu3 %v632_v40 }
 0x1fe   :  { %v471_v30 = vpop.f32.mrf.mxu2  ;;  %v587_v34 = vpop.f32.mrf.mxu3 }
 0x1ff   :  { %v2436_v46 = vadd.f32 %v471_v30, %v2324_v55  ;;  %v2439_v35 = vadd.f32 %v587_v34, %v2125_v59 }
 0x201   :  { %v650_v49 = vmax.f32 %v2439_v35, 0.0  ;;  %v633_v2 = vmax.f32 %v2436_v46, 0.0 }
 0x203   :  { %521 = vmatmul.f32.gmra.mxu2 %v398_v4  ;;  %774 = vmatmul.f32.gmra.mxu0 %v633_v2 }
 0x204   :  { %890 = vmatmul.f32.gmra.mxu1 %v650_v49  ;;  %1050 = vmatmul.f32.gmra.mxu3 %v634_v56 }
 0x206   :  { %v474_v37 = vpop.f32.mrf.mxu2  ;;  %v590_v40 = vpop.f32.mrf.mxu3 }
 0x207   :  { %v2452_v14 = vadd.f32 %v474_v37, %v2324_v55  ;;  %v2455_v26 = vadd.f32 %v590_v40, %v2125_v59 }
 0x209   :  { %v652_v41 = vmax.f32 %v2455_v26, 0.0  ;;  %v635_v4 = vmax.f32 %v2452_v14, 0.0  ;;  %v1164_v26 = vld [vmem:[%s3062_s9 + $0x18] sm:$0xff] }
 0x20a   :  { %1209 = vmatpush.msra.mxu0 %v1164_v26 }
 0x20b   :  { %524 = vmatmul.f32.gmra.mxu2 %v399_v8  ;;  %777 = vmatmul.f32.gmra.mxu0 %v635_v4 }
 0x20c   :  { %893 = vmatmul.f32.gmra.mxu1 %v652_v41  ;;  %1053 = vmatmul.f32.gmra.mxu3 %v636_v1  ;;  %v1185_v1 = vld [vmem:[%s3062_s9 + $0xc0] sm:$0xff] }
 0x20d   :  { %1296 = vmatpush.msra.mxu1 %v1185_v1 }
 0x20e   :  { %v477_v56 = vpop.f32.mrf.mxu2  ;;  %v593_v32 = vpop.f32.mrf.mxu3 }
 0x20f   :  { %v2474_v62 = vadd.f32 %v477_v56, %v2324_v55  ;;  %v2477_v44 = vadd.f32 %v593_v32, %v2125_v59  ;;  %1297 = vmatpush.msra.mxu1 %v1184_v31 }
 0x211   :  { %v654_v58 = vmax.f32 %v2477_v44, 0.0  ;;  %v637_v8 = vmax.f32 %v2474_v62, 0.0  ;;  %1298 = vmatpush.msra.mxu1 %v1183_v23 }
 0x212   :  { %v2541_v29 = vpop.f32.mrf.mxu1 }
 0x213   :  { %527 = vmatmul.f32.gmra.mxu2 %v400_v27  ;;  %780 = vmatmul.f32.gmra.mxu0 %v637_v8 }
 0x214   :  { %896 = vmatmul.f32.gmra.mxu1 %v654_v58  ;;  %1056 = vmatmul.f32.gmra.mxu3 %v638_v24 }
 0x216   :  { %v480_v25 = vpop.f32.mrf.mxu2  ;;  %v596_v27 = vpop.f32.mrf.mxu3 }
 0x217   :  { %v2496_v38 = vadd.f32 %v480_v25, %v2324_v55  ;;  %v2499_v28 = vadd.f32 %v596_v27, %v2125_v59 }
 0x219   :  { %v656_v18 = vmax.f32 %v2499_v28, 0.0  ;;  %v639_v24 = vmax.f32 %v2496_v38, 0.0 }
 0x21b   :  { %783 = vmatmul.f32.gmra.mxu0 %v639_v24  ;;  %943 = vmatmul.f32.vlgmr.msra.gmra.mxu2 %v623_v17 }
 0x21c   :  { %899 = vmatmul.f32.gmra.mxu1 %v656_v18  ;;  %1059 = vmatmul.f32.gmra.mxu3 %v640_v54 }
 0x21e   :  { %v483_v33 = vpop.f32.mrf.mxu2  ;;  %v599_v10 = vpop.f32.mrf.mxu3 }
 0x21f   :  { %v2512_v63 = vadd.f32 %v483_v33, %v2324_v55  ;;  %v2515_v47 = vadd.f32 %v599_v10, %v2125_v59 }
 0x221   :  { %v658_v51 = vmax.f32 %v2515_v47, 0.0  ;;  %v641_v19 = vmax.f32 %v2512_v63, 0.0  ;;  %v1162_v47 = vld [vmem:[%s3062_s9 + $0x8] sm:$0xff] }
 0x223   :  { %786 = vmatmul.f32.gmra.mxu0 %v641_v19  ;;  %946 = vmatmul.f32.gmra.mxu2 %v625_v0 }
 0x224   :  { %902 = vmatmul.f32.gmra.mxu1 %v658_v51  ;;  %1062 = vmatmul.f32.gmra.mxu3 %v642_v39 }
 0x226   :  { %v486_v54 = vpop.f32.mrf.mxu2  ;;  %v602_v17 = vpop.f32.mrf.mxu3 }
 0x227   :  { %v2534_v7 = vadd.f32 %v486_v54, %v2324_v55  ;;  %v2537_v61 = vadd.f32 %v602_v17, %v2125_v59 }
 0x229   :  { %v643_v42 = vmax.f32 %v2534_v7, 0.0  ;;  %v660_v22 = vmax.f32 %v2537_v61, 0.0 }
 0x22b   :  { %789 = vmatmul.f32.gmra.mxu0 %v643_v42  ;;  %949 = vmatmul.f32.gmra.mxu2 %v627_v45 }
 0x22c   :  { %905 = vmatmul.f32.gmra.mxu1 %v660_v22  ;;  %1065 = vmatmul.f32.gmra.mxu3 %v644_v5  ;;  %v2573_v5 = vpop.f32.mrf.mxu1 }
 0x22e   :  { %v489_v39 = vpop.f32.mrf.mxu2  ;;  %v605_v0 = vpop.f32.mrf.mxu3 }
 0x22f   :  { %v2555_v3 = vadd.f32 %v489_v39, %v2324_v55  ;;  %v2558_v43 = vadd.f32 %v605_v0, %v2125_v59 }
 0x231   :  { %v645_v15 = vmax.f32 %v2555_v3, 0.0  ;;  %v662_v45 = vmax.f32 %v2558_v43, 0.0 }
 0x233   :  { %792 = vmatmul.f32.gmra.mxu0 %v645_v15  ;;  %952 = vmatmul.f32.gmra.mxu2 %v629_v9 }
 0x234   :  { %908 = vmatmul.f32.gmra.mxu1 %v662_v45  ;;  %1068 = vmatmul.f32.gmra.mxu3 %v646_v12  ;;  %v1182_v12 = vld [vmem:[%s3062_s9 + $0xa8] sm:$0xff]  ;;  %v2597_v53 = vpop.f32.mrf.mxu1 }
 0x235   :  { %1299 = vmatpush.msra.mxu1 %v1182_v12 }
 0x236   :  { %v492_v20 = vpop.f32.mrf.mxu2  ;;  %v608_v11 = vpop.f32.mrf.mxu3 }
 0x237   :  { %v2576_v30 = vadd.f32 %v492_v20, %v2324_v55  ;;  %v2579_v34 = vadd.f32 %v608_v11, %v2125_v59  ;;  %v1163_v11 = vld [vmem:[%s3062_s9 + $0x10] sm:$0xff] }
 0x238   :  { %1210 = vmatpush.msra.mxu0 %v1163_v11 }
 0x239   :  { %v647_v37 = vmax.f32 %v2576_v30, 0.0  ;;  %v664_v16 = vmax.f32 %v2579_v34, 0.0 }
 0x23a   :  { %1211 = vmatpush.msra.mxu0 %v1162_v47 }
 0x23b   :  { %795 = vmatmul.f32.gmra.mxu0 %v647_v37  ;;  %955 = vmatmul.f32.gmra.mxu2 %v631_v48 }
 0x23c   :  { %911 = vmatmul.f32.gmra.mxu1 %v664_v16  ;;  %1071 = vmatmul.f32.gmra.mxu3 %v648_v13  ;;  %v2624_v46 = vpop.f32.mrf.mxu1 }
 0x23e   :  { %v495_v9 = vpop.f32.mrf.mxu2  ;;  %v611_v40 = vpop.f32.mrf.mxu3 }
 0x23f   :  { %v2600_v48 = vadd.f32 %v495_v9, %v2324_v55  ;;  %v2603_v57 = vadd.f32 %v611_v40, %v2125_v59 }
 0x241   :  { %v649_v13 = vmax.f32 %v2600_v48, 0.0  ;;  %v666_v60 = vmax.f32 %v2603_v57, 0.0 }
 0x243   :  { %798 = vmatmul.f32.gmra.mxu0 %v649_v13  ;;  %958 = vmatmul.f32.gmra.mxu2 %v633_v2 }
 0x244   :  { %914 = vmatmul.f32.gmra.mxu1 %v666_v60  ;;  %1074 = vmatmul.f32.gmra.mxu3 %v650_v49  ;;  %v1181_v49 = vld [vmem:[%s3062_s9 + $0xa0] sm:$0xff]  ;;  %v2647_v14 = vpop.f32.mrf.mxu1 }
 0x245   :  { %1300 = vmatpush.msra.mxu1 %v1181_v49 }
 0x246   :  { %v498_v56 = vpop.f32.mrf.mxu2  ;;  %v614_v32 = vpop.f32.mrf.mxu3 }
 0x247   :  { %v2619_v6 = vadd.f32 %v498_v56, %v2324_v55  ;;  %v2622_v1 = vadd.f32 %v614_v32, %v2125_v59 }
 0x249   :  { %v651_v2 = vmax.f32 %v2619_v6, 0.0  ;;  %v668_v35 = vmax.f32 %v2622_v1, 0.0 }
 0x24b   :  { %801 = vmatmul.f32.gmra.mxu0 %v651_v2  ;;  %961 = vmatmul.f32.gmra.mxu2 %v635_v4 }
 0x24c   :  { %917 = vmatmul.f32.gmra.mxu1 %v668_v35  ;;  %1077 = vmatmul.f32.gmra.mxu3 %v652_v41  ;;  %v1180_v41 = vld [vmem:[%s3062_s9 + $0x98] sm:$0xff] }
 0x24d   :  { %1301 = vmatpush.msra.mxu1 %v1180_v41 }
 0x24e   :  { %v501_v25 = vpop.f32.mrf.mxu2  ;;  %v617_v27 = vpop.f32.mrf.mxu3 }
 0x24f   :  { %v2640_v33 = vadd.f32 %v501_v25, %v2324_v55  ;;  %v2643_v10 = vadd.f32 %v617_v27, %v2125_v59 }
 0x251   :  { %v653_v50 = vmax.f32 %v2640_v33, 0.0  ;;  %v670_v31 = vmax.f32 %v2643_v10, 0.0 }
 0x253   :  { %804 = vmatmul.f32.gmra.mxu0 %v653_v50  ;;  %964 = vmatmul.f32.gmra.mxu2 %v637_v8 }
 0x254   :  { %920 = vmatmul.f32.gmra.mxu1 %v670_v31  ;;  %1080 = vmatmul.f32.gmra.mxu3 %v654_v58  ;;  %v2680_v58 = vld [vmem:[%s3063_s8] sm:$0x3] }
 0x255   :  { %v2687_v0 = vperm.slane %v2680_v58, 0 }
 0x256   :  { %v504_v4 = vpop.f32.mrf.mxu2  ;;  %v620_v54 = vpop.f32.mrf.mxu3 }
 0x257   :  { %v2664_v62 = vadd.f32 %v504_v4, %v2324_v55  ;;  %v2667_v8 = vadd.f32 %v620_v54, %v2125_v59  ;;  %v867_v59 = vpop.f32.mrf.mxu1 }
 0x258   :  { %v2669_v17 = vpop.f32.mrf.mxu0 }
 0x259   :  { %v655_v21 = vmax.f32 %v2664_v62, 0.0  ;;  %v672_v44 = vmax.f32 %v2667_v8, 0.0 }
 0x25b   :  { %807 = vmatmul.f32.gmra.mxu0 %v655_v21  ;;  %967 = vmatmul.f32.gmra.mxu2 %v639_v24 }
 0x25c   :  { %923 = vmatmul.f32.gmra.mxu1 %v672_v44  ;;  %1083 = vmatmul.f32.gmra.mxu3 %v656_v18  ;;  %v1179_v18 = vld [vmem:[%s3062_s9 + $0x90] sm:$0xff] }
 0x25d   :  { %1302 = vmatpush.msra.mxu1 %v1179_v18 }
 0x25e   :  { %v507_v39 = vpop.f32.mrf.mxu2 }
 0x25f   :  { %v2690_v23 = vadd.f32 %v507_v39, %v2324_v55  ;;  %v870_v12 = vpop.f32.mrf.mxu1  ;;  %v2732_v56 = vpop.f32.mrf.mxu3 }
 0x260   :  { %v763_v38 = vpop.f32.mrf.mxu0 }
 0x261   :  { %v657_v24 = vmax.f32 %v2690_v23, 0.0  ;;  %v764_v20 = vadd.f32 %v763_v38, %v2687_v0 }
 0x263   :  { %v2698_v28 = vadd.f32 %v2573_v5, %v764_v20  ;;  %810 = vmatmul.f32.gmra.mxu0 %v657_v24  ;;  %970 = vmatmul.f32.gmra.mxu2 %v641_v19 }
 0x264   :  { %1086 = vmatmul.f32.gmra.mxu3 %v658_v51  ;;  %v1178_v51 = vld [vmem:[%s3062_s9 + $0x88] sm:$0xff] }
 0x265   :  { %1303 = vmatpush.msra.mxu1 %v1178_v51  ;;  %v761_v51 = vadd.f32 %v2669_v17, %v2687_v0 }
 0x266   :  { %v510_v52 = vpop.f32.mrf.mxu2 }
 0x267   :  { %v2710_v9 = vadd.f32 %v510_v52, %v2324_v55  ;;  %v2753_v4 = vpop.f32.mrf.mxu3  ;;  %v853_v10 = vadd.f32 %v2541_v29, %v761_v51 }
 0x268   :  { %v766_v5 = vpop.f32.mrf.mxu0 }
 0x269   :  { %v659_v40 = vmax.f32 %v2710_v9, 0.0  ;;  %v767_v36 = vadd.f32 %v766_v5, %v2687_v0 }
 0x26b   :  { %v2715_v63 = vadd.f32 %v2597_v53, %v767_v36  ;;  %813 = vmatmul.f32.gmra.mxu0 %v659_v40  ;;  %973 = vmatmul.f32.gmra.mxu2 %v643_v42  ;;  %v873_v42 = vpop.f32.mrf.mxu1 }
 0x26c   :  { %1089 = vmatmul.f32.gmra.mxu3 %v660_v22 }
 0x26e   :  { %v513_v19 = vpop.f32.mrf.mxu2 }
 0x26f   :  { %v2730_v53 = vadd.f32 %v513_v19, %v2324_v55  ;;  %v2778_v30 = vpop.f32.mrf.mxu3 }
 0x270   :  { %v769_v7 = vpop.f32.mrf.mxu0 }
 0x271   :  { %v661_v32 = vmax.f32 %v2730_v53, 0.0  ;;  %v770_v49 = vadd.f32 %v769_v7, %v2687_v0 }
 0x273   :  { %v2737_v61 = vadd.f32 %v2624_v46, %v770_v49  ;;  %816 = vmatmul.f32.gmra.mxu0 %v661_v32  ;;  %976 = vmatmul.f32.gmra.mxu2 %v645_v15  ;;  %v1161_v46 = vld [vmem:[%s3062_s9] sm:$0xff]  ;;  %v876_v3 = vpop.f32.mrf.mxu1  ;;  %v1111_v49 = vmax.f32 %v853_v10, 0.0 }
 0x274   :  { %1092 = vmatmul.f32.gmra.mxu3 %v662_v45  ;;  %1212 = vmatpush.msra.mxu0 %v1161_v46  ;;  %v1177_v15 = vld [vmem:[%s3062_s9 + $0x80] sm:$0xff] }
 0x275   :  { %1304 = vmatpush.msra.mxu1 %v1177_v15 }
 0x276   :  { %v516_v22 = vpop.f32.mrf.mxu2 }
 0x277   :  { %v2746_v25 = vadd.f32 %v516_v22, %v2324_v55  ;;  %v2795_v48 = vpop.f32.mrf.mxu3 }
 0x278   :  { %v772_v27 = vpop.f32.mrf.mxu0 }
 0x279   :  { %v663_v26 = vmax.f32 %v2746_v25, 0.0  ;;  %v773_v41 = vadd.f32 %v772_v27, %v2687_v0 }
 0x27b   :  { %v2756_v43 = vadd.f32 %v2647_v14, %v773_v41  ;;  %819 = vmatmul.f32.gmra.mxu0 %v663_v26  ;;  %979 = vmatmul.f32.gmra.mxu2 %v647_v37  ;;  %v879_v34 = vpop.f32.mrf.mxu1 }
 0x27c   :  { %1095 = vmatmul.f32.gmra.mxu3 %v664_v16 }
 0x27e   :  { %v519_v45 = vpop.f32.mrf.mxu2 }
 0x27f   :  { %v2768_v54 = vadd.f32 %v519_v45, %v2324_v55 }
 0x280   :  { %v775_v14 = vpop.f32.mrf.mxu0 }
 0x281   :  { %v665_v39 = vmax.f32 %v2768_v54, 0.0  ;;  %v776_v38 = vadd.f32 %v775_v14, %v2687_v0 }
 0x283   :  { %v2772_v20 = vadd.f32 %v867_v59, %v776_v38  ;;  %822 = vmatmul.f32.gmra.mxu0 %v665_v39  ;;  %982 = vmatmul.f32.gmra.mxu2 %v649_v13  ;;  %v882_v13 = vpop.f32.mrf.mxu1 }
 0x284   :  { %1098 = vmatmul.f32.gmra.mxu3 %v666_v60 }
 0x286   :  { %v522_v37 = vpop.f32.mrf.mxu2 }
 0x287   :  { %v2783_v16 = vadd.f32 %v522_v37, %v2324_v55 }
 0x288   :  { %v778_v11 = vpop.f32.mrf.mxu0 }
 0x289   :  { %v667_v59 = vmax.f32 %v2783_v16, 0.0  ;;  %v779_v18 = vadd.f32 %v778_v11, %v2687_v0 }
 0x28b   :  { %v2787_v52 = vadd.f32 %v870_v12, %v779_v18  ;;  %825 = vmatmul.f32.gmra.mxu0 %v667_v59  ;;  %985 = vmatmul.f32.gmra.mxu2 %v651_v2  ;;  %v2813_v2 = vpop.f32.mrf.mxu3  ;;  %v885_v19 = vpop.f32.mrf.mxu1 }
 0x28c   :  { %1101 = vmatmul.f32.gmra.mxu3 %v668_v35 }
 0x28e   :  { %v525_v57 = vpop.f32.mrf.mxu2 }
 0x28f   :  { %v2798_v60 = vadd.f32 %v525_v57, %v2324_v55 }
 0x290   :  { %v781_v5 = vpop.f32.mrf.mxu0 }
 0x291   :  { %v669_v12 = vmax.f32 %v2798_v60, 0.0  ;;  %v782_v36 = vadd.f32 %v781_v5, %v2687_v0 }
 0x293   :  { %v2802_v47 = vadd.f32 %v873_v42, %v782_v36  ;;  %828 = vmatmul.f32.gmra.mxu0 %v669_v12  ;;  %988 = vmatmul.f32.gmra.mxu2 %v653_v50  ;;  %v888_v22 = vpop.f32.mrf.mxu1  ;;  %v1051_v62 = vpop.f32.mrf.mxu3 }
 0x294   :  { %1104 = vmatmul.f32.gmra.mxu3 %v670_v31 }
 0x296   :  { %v528_v6 = vpop.f32.mrf.mxu2 }
 0x297   :  { %v2811_v1 = vadd.f32 %v528_v6, %v2324_v55  ;;  %v2826_v55 = vperm.slane %v2680_v58, 1 }
 0x298   :  { %v784_v35 = vpop.f32.mrf.mxu0 }
 0x299   :  { %v671_v7 = vmax.f32 %v2811_v1, 0.0  ;;  %v785_v42 = vadd.f32 %v784_v35, %v2687_v0 }
 0x29b   :  { %v2819_v33 = vadd.f32 %v876_v3, %v785_v42  ;;  %831 = vmatmul.f32.gmra.mxu0 %v671_v7  ;;  %991 = vmatmul.f32.gmra.mxu2 %v655_v21  ;;  %v891_v15 = vpop.f32.mrf.mxu1  ;;  %v1054_v23 = vpop.f32.mrf.mxu3 }
 0x29c   :  { %1107 = vmatmul.f32.gmra.mxu3 %v672_v44 }
 0x29e   :  { %v944_v50 = vpop.f32.mrf.mxu2 }
 0x29f   :  { %v945_v31 = vadd.f32 %v944_v50, %v2826_v55 }
 0x2a0   :  { %v787_v17 = vpop.f32.mrf.mxu0 }
 0x2a1   :  { %v1037_v27 = vadd.f32 %v2732_v56, %v945_v31  ;;  %v788_v41 = vadd.f32 %v787_v17, %v2687_v0  ;;  %v1113_v56 = vmax.f32 %v2698_v28, 0.0  ;;  %v1115_v28 = vmax.f32 %v2715_v63, 0.0 }
 0x2a2   :  { %v1117_v63 = vmax.f32 %v2737_v61, 0.0  ;;  %v1119_v61 = vmax.f32 %v2756_v43, 0.0 }
 0x2a3   :  { %v1112_v21 = vmax.f32 %v1037_v27, 0.0  ;;  %v2834_v46 = vadd.f32 %v879_v34, %v788_v41  ;;  %994 = vmatmul.f32.gmra.mxu2 %v657_v24  ;;  %1213 = vmatmul.f32.vlgmr.msra.gmra.mxu0 %v1111_v49  ;;  %v894_v9 = vpop.f32.mrf.mxu1  ;;  %v1121_v27 = vmax.f32 %v2772_v20, 0.0 }
 0x2a5   :  { %1305 = vmatmul.f32.vlgmr.msra.gmra.mxu1 %v1112_v21 }
 0x2a6   :  { %v947_v29 = vpop.f32.mrf.mxu2 }
 0x2a7   :  { %v948_v8 = vadd.f32 %v947_v29, %v2826_v55 }
 0x2a8   :  { %v790_v44 = vpop.f32.mrf.mxu0 }
 0x2a9   :  { %v1040_v58 = vadd.f32 %v2753_v4, %v948_v8  ;;  %v791_v3 = vadd.f32 %v790_v44, %v2687_v0  ;;  %v1123_v44 = vmax.f32 %v2787_v52, 0.0 }
 0x2ab   :  { %v1114_v45 = vmax.f32 %v1040_v58, 0.0  ;;  %v2842_v14 = vadd.f32 %v882_v13, %v791_v3  ;;  %997 = vmatmul.f32.gmra.mxu2 %v659_v40  ;;  %1216 = vmatmul.f32.gmra.mxu0 %v1113_v56  ;;  %v1057_v40 = vpop.f32.mrf.mxu3 }
 0x2ad   :  { %1308 = vmatmul.f32.gmra.mxu1 %v1114_v45 }
 0x2ae   :  { %v950_v24 = vpop.f32.mrf.mxu2 }
 0x2af   :  { %v951_v38 = vadd.f32 %v950_v24, %v2826_v55  ;;  %v1125_v24 = vmax.f32 %v2802_v47, 0.0 }
 0x2b0   :  { %v793_v34 = vpop.f32.mrf.mxu0 }
 0x2b1   :  { %v1043_v4 = vadd.f32 %v2778_v30, %v951_v38  ;;  %v794_v37 = vadd.f32 %v793_v34, %v2687_v0 }
 0x2b3   :  { %v1116_v11 = vmax.f32 %v1043_v4, 0.0  ;;  %v2850_v18 = vadd.f32 %v885_v19, %v794_v37  ;;  %1000 = vmatmul.f32.gmra.mxu2 %v661_v32  ;;  %1219 = vmatmul.f32.gmra.mxu0 %v1115_v28  ;;  %v897_v32 = vpop.f32.mrf.mxu1  ;;  %v1060_v19 = vpop.f32.mrf.mxu3 }
 0x2b5   :  { %1311 = vmatmul.f32.gmra.mxu1 %v1116_v11 }
 0x2b6   :  { %v953_v57 = vpop.f32.mrf.mxu2 }
 0x2b7   :  { %v954_v13 = vadd.f32 %v953_v57, %v2826_v55 }
 0x2b8   :  { %v796_v5 = vpop.f32.mrf.mxu0 }
 0x2b9   :  { %v1046_v30 = vadd.f32 %v2795_v48, %v954_v13  ;;  %v797_v36 = vadd.f32 %v796_v5, %v2687_v0 }
 0x2bb   :  { %v1118_v6 = vmax.f32 %v1046_v30, 0.0  ;;  %v2858_v35 = vadd.f32 %v888_v22, %v797_v36  ;;  %1003 = vmatmul.f32.gmra.mxu2 %v663_v26  ;;  %1222 = vmatmul.f32.gmra.mxu0 %v1117_v63  ;;  %v900_v49 = vpop.f32.mrf.mxu1  ;;  %v1063_v41 = vpop.f32.mrf.mxu3  ;;  %v1129_v63 = vmax.f32 %v2834_v46, 0.0 }
 0x2bd   :  { %1314 = vmatmul.f32.gmra.mxu1 %v1118_v6 }
 0x2be   :  { %v956_v53 = vpop.f32.mrf.mxu2 }
 0x2bf   :  { %v957_v51 = vadd.f32 %v956_v53, %v2826_v55 }
 0x2c0   :  { %v799_v42 = vpop.f32.mrf.mxu0 }
 0x2c1   :  { %v1049_v48 = vadd.f32 %v2813_v2, %v957_v51  ;;  %v800_v10 = vadd.f32 %v799_v42, %v2687_v0 }
 0x2c3   :  { %v1120_v50 = vmax.f32 %v1049_v48, 0.0  ;;  %v2866_v31 = vadd.f32 %v891_v15, %v800_v10  ;;  %1006 = vmatmul.f32.gmra.mxu2 %v665_v39  ;;  %1225 = vmatmul.f32.gmra.mxu0 %v1119_v61  ;;  %v903_v58 = vpop.f32.mrf.mxu1  ;;  %v1066_v16 = vpop.f32.mrf.mxu3  ;;  %v1131_v10 = vmax.f32 %v2842_v14, 0.0 }
 0x2c5   :  { %1317 = vmatmul.f32.gmra.mxu1 %v1120_v50 }
 0x2c6   :  { %v959_v25 = vpop.f32.mrf.mxu2 }
 0x2c7   :  { %v960_v26 = vadd.f32 %v959_v25, %v2826_v55 }
 0x2c8   :  { %v802_v17 = vpop.f32.mrf.mxu0 }
 0x2c9   :  { %v1052_v22 = vadd.f32 %v1051_v62, %v960_v26  ;;  %v803_v2 = vadd.f32 %v802_v17, %v2687_v0 }
 0x2cb   :  { %v1122_v43 = vmax.f32 %v1052_v22, 0.0  ;;  %v2873_v21 = vadd.f32 %v894_v9, %v803_v2  ;;  %1009 = vmatmul.f32.gmra.mxu2 %v667_v59  ;;  %1228 = vmatmul.f32.gmra.mxu0 %v1121_v27  ;;  %v906_v60 = vpop.f32.mrf.mxu1  ;;  %v1127_v9 = vmax.f32 %v2819_v33, 0.0  ;;  %v1133_v2 = vmax.f32 %v2850_v18, 0.0 }
 0x2cd   :  { %1320 = vmatmul.f32.gmra.mxu1 %v1122_v43 }
 0x2ce   :  { %v962_v54 = vpop.f32.mrf.mxu2 }
 0x2cf   :  { %v963_v39 = vadd.f32 %v962_v54, %v2826_v55 }
 0x2d0   :  { %v805_v29 = vpop.f32.mrf.mxu0 }
 0x2d1   :  { %v1055_v8 = vadd.f32 %v1054_v23, %v963_v39  ;;  %v806_v62 = vadd.f32 %v805_v29, %v2687_v0 }
 0x2d3   :  { %v1124_v20 = vmax.f32 %v1055_v8, 0.0  ;;  %v2880_v3 = vadd.f32 %v897_v32, %v806_v62  ;;  %1012 = vmatmul.f32.gmra.mxu2 %v669_v12  ;;  %1231 = vmatmul.f32.gmra.mxu0 %v1123_v44  ;;  %v1069_v12 = vpop.f32.mrf.mxu3  ;;  %v1135_v44 = vmax.f32 %v2858_v35, 0.0 }
 0x2d5   :  { %1323 = vmatmul.f32.gmra.mxu1 %v1124_v20 }
 0x2d6   :  { %v965_v59 = vpop.f32.mrf.mxu2 }
 0x2d7   :  { %v966_v56 = vadd.f32 %v965_v59, %v2826_v55 }
 0x2d8   :  { %v808_v15 = vpop.f32.mrf.mxu0 }
 0x2d9   :  { %v1058_v45 = vadd.f32 %v1057_v40, %v966_v56  ;;  %v809_v23 = vadd.f32 %v808_v15, %v2687_v0 }
 0x2db   :  { %v1126_v52 = vmax.f32 %v1058_v45, 0.0  ;;  %v2887_v38 = vadd.f32 %v900_v49, %v809_v23  ;;  %1015 = vmatmul.f32.gmra.mxu2 %v671_v7  ;;  %1234 = vmatmul.f32.gmra.mxu0 %v1125_v24  ;;  %v909_v7 = vpop.f32.mrf.mxu1  ;;  %v1072_v13 = vpop.f32.mrf.mxu3  ;;  %v1137_v24 = vmax.f32 %v2866_v31, 0.0 }
 0x2dd   :  { %1326 = vmatmul.f32.gmra.mxu1 %v1126_v52 }
 0x2de   :  { %v968_v34 = vpop.f32.mrf.mxu2 }
 0x2df   :  { %v969_v4 = vadd.f32 %v968_v34, %v2826_v55 }
 0x2e0   :  { %v811_v37 = vpop.f32.mrf.mxu0 }
 0x2e1   :  { %v1061_v28 = vadd.f32 %v1060_v19, %v969_v4  ;;  %v812_v11 = vadd.f32 %v811_v37, %v2687_v0 }
 0x2e3   :  { %v1128_v47 = vmax.f32 %v1061_v28, 0.0  ;;  %v2894_v40 = vadd.f32 %v903_v58, %v812_v11  ;;  %1237 = vmatmul.f32.gmra.mxu0 %v1127_v9  ;;  %v912_v19 = vpop.f32.mrf.mxu1  ;;  %v1075_v61 = vpop.f32.mrf.mxu3  ;;  %v1139_v9 = vmax.f32 %v2873_v21, 0.0  ;;  %v2934_v21 = vld [vmem:[%s3064_s10] ss:$0 sm:$0xff] }
 0x2e5   :  { %1329 = vmatmul.f32.gmra.mxu1 %v1128_v47 }
 0x2e6   :  { %v971_v1 = vpop.f32.mrf.mxu2 }
 0x2e7   :  { %v972_v57 = vadd.f32 %v971_v1, %v2826_v55 }
 0x2e8   :  { %v814_v5 = vpop.f32.mrf.mxu0 }
 0x2e9   :  { %v1064_v30 = vadd.f32 %v1063_v41, %v972_v57  ;;  %v815_v36 = vadd.f32 %v814_v5, %v2687_v0 }
 0x2eb   :  { %v1130_v6 = vmax.f32 %v1064_v30, 0.0  ;;  %v2899_v53 = vadd.f32 %v906_v60, %v815_v36  ;;  %1240 = vmatmul.f32.gmra.mxu0 %v1129_v63  ;;  %v915_v27 = vpop.f32.mrf.mxu1  ;;  %v1078_v14 = vpop.f32.mrf.mxu3  ;;  %v1141_v30 = vmax.f32 %v2880_v3, 0.0  ;;  %v1143_v3 = vmax.f32 %v2887_v38, 0.0 }
 0x2ed   :  { %1332 = vmatmul.f32.gmra.mxu1 %v1130_v6 }
 0x2ee   :  { %v974_v33 = vpop.f32.mrf.mxu2 }
 0x2ef   :  { %v975_v32 = vadd.f32 %v974_v33, %v2826_v55 }
 0x2f0   :  { %v817_v51 = vpop.f32.mrf.mxu0 }
 0x2f1   :  { %v1067_v42 = vadd.f32 %v1066_v16, %v975_v32  ;;  %v818_v48 = vadd.f32 %v817_v51, %v2687_v0 }
 0x2f3   :  { %v1132_v50 = vmax.f32 %v1067_v42, 0.0  ;;  %v2904_v25 = vadd.f32 %v909_v7, %v818_v48  ;;  %1243 = vmatmul.f32.gmra.mxu0 %v1131_v10  ;;  %v918_v18 = vpop.f32.mrf.mxu1  ;;  %v1081_v16 = vpop.f32.mrf.mxu3 }
 0x2f5   :  { %1335 = vmatmul.f32.gmra.mxu1 %v1132_v50 }
 0x2f6   :  { %v977_v46 = vpop.f32.mrf.mxu2 }
 0x2f7   :  { %v978_v26 = vadd.f32 %v977_v46, %v2826_v55 }
 0x2f8   :  { %v820_v17 = vpop.f32.mrf.mxu0 }
 0x2f9   :  { %v1070_v49 = vadd.f32 %v1069_v12, %v978_v26  ;;  %v821_v22 = vadd.f32 %v820_v17, %v2687_v0 }
 0x2fb   :  { %v1134_v41 = vmax.f32 %v1070_v49, 0.0  ;;  %v2909_v43 = vadd.f32 %v912_v19, %v821_v22  ;;  %1246 = vmatmul.f32.gmra.mxu0 %v1133_v2  ;;  %v921_v12 = vpop.f32.mrf.mxu1  ;;  %v1084_v4 = vpop.f32.mrf.mxu3  ;;  %v1145_v2 = vmax.f32 %v2894_v40, 0.0  ;;  %v1147_v40 = vmax.f32 %v2899_v53, 0.0 }
 0x2fc   :  { %v1149_v53 = vmax.f32 %v2904_v25, 0.0 }
 0x2fd   :  { %1338 = vmatmul.f32.gmra.mxu1 %v1134_v41  ;;  %v1151_v25 = vmax.f32 %v2909_v43, 0.0 }
 0x2fe   :  { %v980_v54 = vpop.f32.mrf.mxu2 }
 0x2ff   :  { %v981_v39 = vadd.f32 %v980_v54, %v2826_v55 }
 0x300   :  { %v823_v29 = vpop.f32.mrf.mxu0 }
 0x301   :  { %v1073_v8 = vadd.f32 %v1072_v13, %v981_v39  ;;  %v824_v62 = vadd.f32 %v823_v29, %v2687_v0 }
 0x303   :  { %v1136_v58 = vmax.f32 %v1073_v8, 0.0  ;;  %v2914_v20 = vadd.f32 %v915_v27, %v824_v62  ;;  %1249 = vmatmul.f32.gmra.mxu0 %v1135_v44  ;;  %v924_v36 = vpop.f32.mrf.mxu1  ;;  %v1087_v63 = vpop.f32.mrf.mxu3 }
 0x305   :  { %1341 = vmatmul.f32.gmra.mxu1 %v1136_v58  ;;  %v1153_v43 = vmax.f32 %v2914_v20, 0.0 }
 0x306   :  { %v983_v59 = vpop.f32.mrf.mxu2 }
 0x307   :  { %v984_v56 = vadd.f32 %v983_v59, %v2826_v55 }
 0x308   :  { %v826_v15 = vpop.f32.mrf.mxu0 }
 0x309   :  { %v1076_v45 = vadd.f32 %v1075_v61, %v984_v56  ;;  %v827_v23 = vadd.f32 %v826_v15, %v2687_v0 }
 0x30b   :  { %v1138_v52 = vmax.f32 %v1076_v45, 0.0  ;;  %v2919_v60 = vadd.f32 %v918_v18, %v827_v23  ;;  %1252 = vmatmul.f32.gmra.mxu0 %v1137_v24  ;;  %v1090_v50 = vpop.f32.mrf.mxu3 }
 0x30d   :  { %1344 = vmatmul.f32.gmra.mxu1 %v1138_v52  ;;  %v1155_v20 = vmax.f32 %v2919_v60, 0.0 }
 0x30e   :  { %v986_v35 = vpop.f32.mrf.mxu2 }
 0x30f   :  { %v987_v34 = vadd.f32 %v986_v35, %v2826_v55 }
 0x310   :  { %v829_v37 = vpop.f32.mrf.mxu0 }
 0x311   :  { %v1079_v28 = vadd.f32 %v1078_v14, %v987_v34  ;;  %v830_v11 = vadd.f32 %v829_v37, %v2687_v0 }
 0x313   :  { %v1140_v47 = vmax.f32 %v1079_v28, 0.0  ;;  %v2924_v1 = vadd.f32 %v921_v12, %v830_v11  ;;  %1255 = vmatmul.f32.gmra.mxu0 %v1139_v9  ;;  %v1093_v54 = vpop.f32.mrf.mxu3 }
 0x315   :  { %1347 = vmatmul.f32.gmra.mxu1 %v1140_v47  ;;  %v1157_v60 = vmax.f32 %v2924_v1, 0.0 }
 0x316   :  { %v989_v31 = vpop.f32.mrf.mxu2 }
 0x317   :  { %v990_v7 = vadd.f32 %v989_v31, %v2826_v55 }
 0x318   :  { %v832_v57 = vpop.f32.mrf.mxu0 }
 0x319   :  { %v1082_v13 = vadd.f32 %v1081_v16, %v990_v7  ;;  %v833_v5 = vadd.f32 %v832_v57, %v2687_v0 }
 0x31b   :  { %v1142_v6 = vmax.f32 %v1082_v13, 0.0  ;;  %v2929_v33 = vadd.f32 %v924_v36, %v833_v5  ;;  %1258 = vmatmul.f32.gmra.mxu0 %v1141_v30  ;;  %v1096_v45 = vpop.f32.mrf.mxu3 }
 0x31d   :  { %1350 = vmatmul.f32.gmra.mxu1 %v1142_v6  ;;  %v1159_v1 = vmax.f32 %v2929_v33, 0.0 }
 0x31e   :  { %v992_v32 = vpop.f32.mrf.mxu2 }
 0x31f   :  { %v993_v51 = vadd.f32 %v992_v32, %v2826_v55 }
 0x320   :  { %v1214_v19 = vpop.f32.mrf.mxu0 }
 0x321   :  { %v1085_v42 = vadd.f32 %v1084_v4, %v993_v51  ;;  %v1215_v0 = vadd.f32 %v2934_v21, %v1214_v19 }
 0x322   :  { %v1306_v48 = vpop.f32.mrf.mxu1 }
 0x323   :  { %v1144_v10 = vmax.f32 %v1085_v42, 0.0  ;;  %v1307_v61 = vadd.f32 %v1306_v48, %v1215_v0  ;;  %1261 = vmatmul.f32.gmra.mxu0 %v1143_v3  ;;  %v1099_v31 = vpop.f32.mrf.mxu3 }
 0x325   :  { %1483 = vtanh.f32 %v1307_v61  ;;  %1353 = vmatmul.f32.gmra.mxu1 %v1144_v10 }
 0x326   :  { %v995_v46 = vpop.f32.mrf.mxu2 }
 0x327   :  { %v996_v26 = vadd.f32 %v995_v46, %v2826_v55 }
 0x328   :  { %v1217_v17 = vpop.f32.mrf.mxu0 }
 0x329   :  { %v1088_v49 = vadd.f32 %v1087_v63, %v996_v26  ;;  %v1218_v22 = vadd.f32 %v2934_v21, %v1217_v17 }
 0x32a   :  { %v1309_v27 = vpop.f32.mrf.mxu1 }
 0x32b   :  { %v1484_v41 = vpop.eup %1483  ;;  %v1146_v14 = vmax.f32 %v1088_v49, 0.0  ;;  %v1310_v38 = vadd.f32 %v1309_v27, %v1218_v22  ;;  %1264 = vmatmul.f32.gmra.mxu0 %v1145_v2  ;;  %v1102_v3 = vpop.f32.mrf.mxu3 }
 0x32c   :  { %1406 = vst [vmem:[%s3065_s11] sm:$0xff] %v1484_v41 }
 0x32d   :  { %1485 = vtanh.f32 %v1310_v38  ;;  %1356 = vmatmul.f32.gmra.mxu1 %v1146_v14 }
 0x32e   :  { %v998_v39 = vpop.f32.mrf.mxu2 }
 0x32f   :  { %v999_v29 = vadd.f32 %v998_v39, %v2826_v55 }
 0x330   :  { %v1220_v8 = vpop.f32.mrf.mxu0 }
 0x331   :  { %v1091_v62 = vadd.f32 %v1090_v50, %v999_v29  ;;  %v1221_v44 = vadd.f32 %v2934_v21, %v1220_v8 }
 0x332   :  { %v1312_v58 = vpop.f32.mrf.mxu1 }
 0x333   :  { %v1486_v18 = vpop.eup %1485  ;;  %v1148_v16 = vmax.f32 %v1091_v62, 0.0  ;;  %v1313_v59 = vadd.f32 %v1312_v58, %v1221_v44  ;;  %1267 = vmatmul.f32.gmra.mxu0 %v1147_v40  ;;  %v1105_v2 = vpop.f32.mrf.mxu3 }
 0x334   :  { %1407 = vst [vmem:[%s3065_s11 + $0x8] sm:$0xff] %v1486_v18 }
 0x335   :  { %1487 = vtanh.f32 %v1313_v59  ;;  %1359 = vmatmul.f32.gmra.mxu1 %v1148_v16 }
 0x336   :  { %v1001_v56 = vpop.f32.mrf.mxu2 }
 0x337   :  { %v1002_v15 = vadd.f32 %v1001_v56, %v2826_v55 }
 0x338   :  { %v1223_v23 = vpop.f32.mrf.mxu0 }
 0x339   :  { %v1094_v24 = vadd.f32 %v1093_v54, %v1002_v15  ;;  %v1224_v52 = vadd.f32 %v2934_v21, %v1223_v23 }
 0x33a   :  { %v1315_v35 = vpop.f32.mrf.mxu1 }
 0x33b   :  { %v1488_v12 = vpop.eup %1487  ;;  %v1150_v34 = vmax.f32 %v1094_v24, 0.0  ;;  %v1316_v4 = vadd.f32 %v1315_v35, %v1224_v52  ;;  %1270 = vmatmul.f32.gmra.mxu0 %v1149_v53  ;;  %v1108_v58 = vpop.f32.mrf.mxu3 }
 0x33c   :  { %1408 = vst [vmem:[%s3065_s11 + $0x10] sm:$0xff] %v1488_v12 }
 0x33d   :  { %1489 = vtanh.f32 %v1316_v4  ;;  %1362 = vmatmul.f32.gmra.mxu1 %v1150_v34 }
 0x33e   :  { %v1004_v37 = vpop.f32.mrf.mxu2 }
 0x33f   :  { %v1005_v28 = vadd.f32 %v1004_v37, %v2826_v55 }
 0x340   :  { %v1226_v11 = vpop.f32.mrf.mxu0 }
 0x341   :  { %v1097_v9 = vadd.f32 %v1096_v45, %v1005_v28  ;;  %v1227_v47 = vadd.f32 %v2934_v21, %v1226_v11 }
 0x342   :  { %v1318_v7 = vpop.f32.mrf.mxu1 }
 0x343   :  { %v1490_v57 = vpop.eup %1489  ;;  %v1152_v13 = vmax.f32 %v1097_v9, 0.0  ;;  %v1319_v5 = vadd.f32 %v1318_v7, %v1227_v47  ;;  %1273 = vmatmul.f32.gmra.mxu0 %v1151_v25 }
 0x344   :  { %1409 = vst [vmem:[%s3065_s11 + $0x18] sm:$0xff] %v1490_v57 }
 0x345   :  { %1491 = vtanh.f32 %v1319_v5  ;;  %1365 = vmatmul.f32.gmra.mxu1 %v1152_v13 }
 0x346   :  { %v1007_v30 = vpop.f32.mrf.mxu2 }
 0x347   :  { %v1008_v36 = vadd.f32 %v1007_v30, %v2826_v55 }
 0x348   :  { %v1229_v63 = vpop.f32.mrf.mxu0 }
 0x349   :  { %v1100_v6 = vadd.f32 %v1099_v31, %v1008_v36  ;;  %v1230_v32 = vadd.f32 %v2934_v21, %v1229_v63 }
 0x34a   :  { %v1321_v51 = vpop.f32.mrf.mxu1 }
 0x34b   :  { %v1492_v19 = vpop.eup %1491  ;;  %v1154_v42 = vmax.f32 %v1100_v6, 0.0  ;;  %v1322_v0 = vadd.f32 %v1321_v51, %v1230_v32  ;;  %1276 = vmatmul.f32.gmra.mxu0 %v1153_v43 }
 0x34c   :  { %1410 = vst [vmem:[%s3065_s11 + $0x20] sm:$0xff] %v1492_v19 }
 0x34d   :  { %1493 = vtanh.f32 %v1322_v0  ;;  %1368 = vmatmul.f32.gmra.mxu1 %v1154_v42 }
 0x34e   :  { %v1010_v48 = vpop.f32.mrf.mxu2 }
 0x34f   :  { %v1011_v10 = vadd.f32 %v1010_v48, %v2826_v55 }
 0x350   :  { %v1232_v61 = vpop.f32.mrf.mxu0 }
 0x351   :  { %v1103_v50 = vadd.f32 %v1102_v3, %v1011_v10  ;;  %v1233_v46 = vadd.f32 %v2934_v21, %v1232_v61 }
 0x352   :  { %v1324_v26 = vpop.f32.mrf.mxu1 }
 0x353   :  { %v1494_v17 = vpop.eup %1493  ;;  %v1156_v49 = vmax.f32 %v1103_v50, 0.0  ;;  %v1325_v22 = vadd.f32 %v1324_v26, %v1233_v46  ;;  %1279 = vmatmul.f32.gmra.mxu0 %v1155_v20 }
 0x354   :  { %1411 = vst [vmem:[%s3065_s11 + $0x28] sm:$0xff] %v1494_v17 }
 0x355   :  { %1495 = vtanh.f32 %v1325_v22  ;;  %1371 = vmatmul.f32.gmra.mxu1 %v1156_v49 }
 0x356   :  { %v1013_v27 = vpop.f32.mrf.mxu2 }
 0x357   :  { %v1014_v41 = vadd.f32 %v1013_v27, %v2826_v55 }
 0x358   :  { %v1235_v14 = vpop.f32.mrf.mxu0 }
 0x359   :  { %v1106_v38 = vadd.f32 %v1105_v2, %v1014_v41  ;;  %v1236_v54 = vadd.f32 %v2934_v21, %v1235_v14 }
 0x35a   :  { %v1327_v39 = vpop.f32.mrf.mxu1 }
 0x35b   :  { %v1496_v29 = vpop.eup %1495  ;;  %v1158_v8 = vmax.f32 %v1106_v38, 0.0  ;;  %v1328_v62 = vadd.f32 %v1327_v39, %v1236_v54  ;;  %1282 = vmatmul.f32.gmra.mxu0 %v1157_v60 }
 0x35c   :  { %1412 = vst [vmem:[%s3065_s11 + $0x30] sm:$0xff] %v1496_v29 }
 0x35d   :  { %1497 = vtanh.f32 %v1328_v62  ;;  %1374 = vmatmul.f32.gmra.mxu1 %v1158_v8 }
 0x35e   :  { %v1016_v44 = vpop.f32.mrf.mxu2 }
 0x35f   :  { %v1017_v40 = vadd.f32 %v1016_v44, %v2826_v55 }
 0x360   :  { %v1238_v18 = vpop.f32.mrf.mxu0 }
 0x361   :  { %v1109_v16 = vadd.f32 %v1108_v58, %v1017_v40  ;;  %v1239_v59 = vadd.f32 %v2934_v21, %v1238_v18 }
 0x362   :  { %v1330_v56 = vpop.f32.mrf.mxu1 }
 0x363   :  { %v1498_v15 = vpop.eup %1497  ;;  %v1160_v45 = vmax.f32 %v1109_v16, 0.0  ;;  %v1331_v23 = vadd.f32 %v1330_v56, %v1239_v59  ;;  %1285 = vmatmul.f32.gmra.mxu0 %v1159_v1 }
 0x364   :  { %1413 = vst [vmem:[%s3065_s11 + $0x38] sm:$0xff] %v1498_v15 }
 0x365   :  { %1499 = vtanh.f32 %v1331_v23  ;;  %1377 = vmatmul.f32.gmra.mxu1 %v1160_v45 }
 0x368   :  { %v1241_v24 = vpop.f32.mrf.mxu0 }
 0x369   :  { %v1242_v55 = vadd.f32 %v2934_v21, %v1241_v24 }
 0x36a   :  { %v1333_v52 = vpop.f32.mrf.mxu1 }
 0x36b   :  { %v1500_v53 = vpop.eup %1499  ;;  %v1334_v35 = vadd.f32 %v1333_v52, %v1242_v55 }
 0x36c   :  { %1414 = vst [vmem:[%s3065_s11 + $0x40] sm:$0xff] %v1500_v53 }
 0x36d   :  { %1501 = vtanh.f32 %v1334_v35 }
 0x370   :  { %v1244_v33 = vpop.f32.mrf.mxu0 }
 0x371   :  { %v1245_v12 = vadd.f32 %v2934_v21, %v1244_v33 }
 0x372   :  { %v1336_v34 = vpop.f32.mrf.mxu1 }
 0x373   :  { %v1502_v4 = vpop.eup %1501  ;;  %v1337_v37 = vadd.f32 %v1336_v34, %v1245_v12 }
 0x374   :  { %1415 = vst [vmem:[%s3065_s11 + $0x48] sm:$0xff] %v1502_v4 }
 0x375   :  { %1503 = vtanh.f32 %v1337_v37 }
 0x378   :  { %v1247_v28 = vpop.f32.mrf.mxu0 }
 0x379   :  { %v1248_v11 = vadd.f32 %v2934_v21, %v1247_v28 }
 0x37a   :  { %v1339_v9 = vpop.f32.mrf.mxu1 }
 0x37b   :  { %v1504_v47 = vpop.eup %1503  ;;  %v1340_v25 = vadd.f32 %v1339_v9, %v1248_v11 }
 0x37c   :  { %1416 = vst [vmem:[%s3065_s11 + $0x50] sm:$0xff] %v1504_v47 }
 0x37d   :  { %1505 = vtanh.f32 %v1340_v25 }
 0x380   :  { %v1250_v31 = vpop.f32.mrf.mxu0 }
 0x381   :  { %v1251_v7 = vadd.f32 %v2934_v21, %v1250_v31 }
 0x382   :  { %v1342_v57 = vpop.f32.mrf.mxu1 }
 0x383   :  { %v1506_v13 = vpop.eup %1505  ;;  %v1343_v5 = vadd.f32 %v1342_v57, %v1251_v7 }
 0x384   :  { %1417 = vst [vmem:[%s3065_s11 + $0x58] sm:$0xff] %v1506_v13 }
 0x385   :  { %1507 = vtanh.f32 %v1343_v5 }
 0x388   :  { %v1253_v30 = vpop.f32.mrf.mxu0 }
 0x389   :  { %v1254_v36 = vadd.f32 %v2934_v21, %v1253_v30 }
 0x38a   :  { %v1345_v63 = vpop.f32.mrf.mxu1 }
 0x38b   :  { %v1508_v6 = vpop.eup %1507  ;;  %v1346_v32 = vadd.f32 %v1345_v63, %v1254_v36 }
 0x38c   :  { %1418 = vst [vmem:[%s3065_s11 + $0x60] sm:$0xff] %v1508_v6 }
 0x38d   :  { %1509 = vtanh.f32 %v1346_v32 }
 0x390   :  { %v1256_v43 = vpop.f32.mrf.mxu0 }
 0x391   :  { %v1257_v51 = vadd.f32 %v2934_v21, %v1256_v43 }
 0x392   :  { %v1348_v19 = vpop.f32.mrf.mxu1 }
 0x393   :  { %v1510_v42 = vpop.eup %1509  ;;  %v1349_v0 = vadd.f32 %v1348_v19, %v1257_v51 }
 0x394   :  { %1419 = vst [vmem:[%s3065_s11 + $0x68] sm:$0xff] %v1510_v42 }
 0x395   :  { %1511 = vtanh.f32 %v1349_v0 }
 0x398   :  { %v1259_v3 = vpop.f32.mrf.mxu0 }
 0x399   :  { %v1260_v48 = vadd.f32 %v2934_v21, %v1259_v3 }
 0x39a   :  { %v1351_v10 = vpop.f32.mrf.mxu1 }
 0x39b   :  { %v1512_v61 = vpop.eup %1511  ;;  %v1352_v50 = vadd.f32 %v1351_v10, %v1260_v48 }
 0x39c   :  { %1420 = vst [vmem:[%s3065_s11 + $0x70] sm:$0xff] %v1512_v61 }
 0x39d   :  { %1513 = vtanh.f32 %v1352_v50 }
 0x3a0   :  { %v1262_v46 = vpop.f32.mrf.mxu0 }
 0x3a1   :  { %v1263_v20 = vadd.f32 %v2934_v21, %v1262_v46 }
 0x3a2   :  { %v1354_v26 = vpop.f32.mrf.mxu1 }
 0x3a3   :  { %v1514_v17 = vpop.eup %1513  ;;  %v1355_v49 = vadd.f32 %v1354_v26, %v1263_v20 }
 0x3a4   :  { %1421 = vst [vmem:[%s3065_s11 + $0x78] sm:$0xff] %v1514_v17 }
 0x3a5   :  { %1515 = vtanh.f32 %v1355_v49 }
 0x3a8   :  { %v1265_v22 = vpop.f32.mrf.mxu0 }
 0x3a9   :  { %v1266_v2 = vadd.f32 %v2934_v21, %v1265_v22 }
 0x3aa   :  { %v1357_v27 = vpop.f32.mrf.mxu1 }
 0x3ab   :  { %v1516_v41 = vpop.eup %1515  ;;  %v1358_v14 = vadd.f32 %v1357_v27, %v1266_v2 }
 0x3ac   :  { %1422 = vst [vmem:[%s3065_s11 + $0x80] sm:$0xff] %v1516_v41 }
 0x3ad   :  { %1517 = vtanh.f32 %v1358_v14 }
 0x3b0   :  { %v1268_v38 = vpop.f32.mrf.mxu0 }
 0x3b1   :  { %v1269_v54 = vadd.f32 %v2934_v21, %v1268_v38 }
 0x3b2   :  { %v1360_v60 = vpop.f32.mrf.mxu1 }
 0x3b3   :  { %v1518_v39 = vpop.eup %1517  ;;  %v1361_v29 = vadd.f32 %v1360_v60, %v1269_v54 }
 0x3b4   :  { %1423 = vst [vmem:[%s3065_s11 + $0x88] sm:$0xff] %v1518_v39 }
 0x3b5   :  { %1519 = vtanh.f32 %v1361_v29 }
 0x3b8   :  { %v1271_v8 = vpop.f32.mrf.mxu0 }
 0x3b9   :  { %v1272_v62 = vadd.f32 %v2934_v21, %v1271_v8 }
 0x3ba   :  { %v1363_v44 = vpop.f32.mrf.mxu1 }
 0x3bb   :  { %v1520_v40 = vpop.eup %1519  ;;  %v1364_v58 = vadd.f32 %v1363_v44, %v1272_v62 }
 0x3bc   :  { %1424 = vst [vmem:[%s3065_s11 + $0x90] sm:$0xff] %v1520_v40 }
 0x3bd   :  { %1521 = vtanh.f32 %v1364_v58 }
 0x3c0   :  { %v1274_v18 = vpop.f32.mrf.mxu0 }
 0x3c1   :  { %v1275_v16 = vadd.f32 %v2934_v21, %v1274_v18 }
 0x3c2   :  { %v1366_v59 = vpop.f32.mrf.mxu1 }
 0x3c3   :  { %v1522_v1 = vpop.eup %1521  ;;  %v1367_v56 = vadd.f32 %v1366_v59, %v1275_v16 }
 0x3c4   :  { %1425 = vst [vmem:[%s3065_s11 + $0x98] sm:$0xff] %v1522_v1 }
 0x3c5   :  { %1523 = vtanh.f32 %v1367_v56 }
 0x3c8   :  { %v1277_v15 = vpop.f32.mrf.mxu0 }
 0x3c9   :  { %v1278_v45 = vadd.f32 %v2934_v21, %v1277_v15 }
 0x3ca   :  { %v1369_v23 = vpop.f32.mrf.mxu1 }
 0x3cb   :  { %v1524_v24 = vpop.eup %1523  ;;  %v1370_v55 = vadd.f32 %v1369_v23, %v1278_v45 }
 0x3cc   :  { %1426 = vst [vmem:[%s3065_s11 + $0xa0] sm:$0xff] %v1524_v24 }
 0x3cd   :  { %1525 = vtanh.f32 %v1370_v55 }
 0x3d0   :  { %v1280_v52 = vpop.f32.mrf.mxu0 }
 0x3d1   :  { %v1281_v53 = vadd.f32 %v2934_v21, %v1280_v52 }
 0x3d2   :  { %v1372_v35 = vpop.f32.mrf.mxu1 }
 0x3d3   :  { %v1526_v33 = vpop.eup %1525  ;;  %v1373_v12 = vadd.f32 %v1372_v35, %v1281_v53 }
 0x3d4   :  { %1427 = vst [vmem:[%s3065_s11 + $0xa8] sm:$0xff] %v1526_v33 }
 0x3d5   :  { %1527 = vtanh.f32 %v1373_v12 }
 0x3d8   :  { %v1283_v34 = vpop.f32.mrf.mxu0 }
 0x3d9   :  { %v1284_v4 = vadd.f32 %v2934_v21, %v1283_v34 }
 0x3da   :  { %v1375_v37 = vpop.f32.mrf.mxu1 }
 0x3db   :  { %v1528_v28 = vpop.eup %1527  ;;  %v1376_v11 = vadd.f32 %v1375_v37, %v1284_v4 }
 0x3dc   :  { %1428 = vst [vmem:[%s3065_s11 + $0xb0] sm:$0xff] %v1528_v28 }
 0x3dd   :  { %1529 = vtanh.f32 %v1376_v11 }
 0x3e0   :  { %v1286_v9 = vpop.f32.mrf.mxu0 }
 0x3e1   :  { %v1287_v47 = vadd.f32 %v2934_v21, %v1286_v9 }
 0x3e2   :  { %v1378_v25 = vpop.f32.mrf.mxu1 }
 0x3e3   :  { %v1530_v31 = vpop.eup %1529  ;;  %v1379_v7 = vadd.f32 %v1378_v25, %v1287_v47 }
 0x3e4   :  { %1429 = vst [vmem:[%s3065_s11 + $0xb8] sm:$0xff] %v1530_v31 }
 0x3e5   :  { %1531 = vtanh.f32 %v1379_v7 }
 0x3eb   :  { %v1532_v57 = vpop.eup %1531 }
 0x3ec   :  { %1430 = vst [vmem:[%s3065_s11 + $0xc0] sm:$0xff] %v1532_v57 }

</bundles_post_ra>
